<compile_context>
chip_gen: v5e
topology: v5e:2x2
jax: 0.10.0
libtpu: 0.0.40
codegen_flags: <defaults>
</compile_context>

<pallas_src>
import functools

import numpy as np
import jax
import jax.numpy as jnp
from jax.experimental import pallas as pl
from jax.experimental.pallas import tpu as pltpu


_TAPS = ((0, 0), (0, 1), (1, 0), (1, 1))   # (di, dj) input taps == (dh, dw) phases


def _round_up(x, m):
    return ((x + m - 1) // m) * m


# ----------------------------------------------------------------------------
# One-time weight transform: PyTorch ConvTranspose2d(k=3, s=2, p=1) params ->
# (4*Cin_pad, Np) matrix mapping the four 2x2 input taps to the four output
# phases (Np = 4*cout rounded up to a lane-dense multiple of 128).
# ----------------------------------------------------------------------------
def prepare_convT_3x3_s2(wt, b, cin_pad, np_):
    cin, cout, kh, kw = wt.shape
    assert (kh, kw) == (3, 3)
    w_all = jnp.zeros((4 * cin_pad, np_), jnp.float32)
    bias = jnp.zeros((1, np_), jnp.float32)
    for t, (di, dj) in enumerate(_TAPS):
        for p, (dh, dw) in enumerate(_TAPS):
            ki = 1 + dh - 2 * di
            kj = 1 + dw - 2 * dj
            if 0 <= ki <= 2 and 0 <= kj <= 2:
                w_all = w_all.at[t * cin_pad:t * cin_pad + cin,
                                 p * cout:(p + 1) * cout].set(wt[:, :, ki, kj])
    for p in range(4):
        bias = bias.at[0, p * cout:(p + 1) * cout].set(b)
    return w_all.astype(jnp.bfloat16), bias


# ----------------------------------------------------------------------------
# Pallas kernel: one (branch, batch) step of the phase-decomposed ConvTranspose.
# ----------------------------------------------------------------------------
def _conv_phase_kernel(x_ref, w_ref, b_ref, o_ref, *, hm, wm, cp):
    """x_ref: (1,1,hm+1,wm+1,cp) bf16 | w_ref: (1,4*cp,Np) bf16
       b_ref: (1,1,Np) f32          | o_ref: (1,1,hm*wm,Np) bf16"""
    acc = None
    for t, (di, dj) in enumerate(_TAPS):
        # Build the (hm*wm, cp) tap matrix from in-VMEM slices (no HBM im2col).
        rows = [x_ref[0, 0, m + di, dj:dj + wm, :] for m in range(hm)]
        tap = rows[0] if hm == 1 else jnp.concatenate(rows, axis=0)
        contrib = jnp.dot(tap, w_ref[0, t * cp:(t + 1) * cp, :],
                          preferred_element_type=jnp.float32)
        acc = contrib if acc is None else acc + contrib
    acc = acc + b_ref[0]
    o_ref[0, 0, :, :] = acc.astype(o_ref.dtype)


def conv_phases(xs, w_all, bias_all):
    """xs: (2, N, hm+1, wm+1, cp) bf16 -> (2, N, hm*wm, Np) bf16 phase tensor."""
    nb, n, hp1, wp1, cp = xs.shape
    _, k4, np_ = w_all.shape
    hm, wm = hp1 - 1, wp1 - 1
    kernel = functools.partial(_conv_phase_kernel, hm=hm, wm=wm, cp=cp)
    return pl.pallas_call(
        kernel,
        out_shape=jax.ShapeDtypeStruct((nb, n, hm * wm, np_), jnp.bfloat16),
        grid=(nb, n),
        in_specs=[
            pl.BlockSpec((1, 1, hp1, wp1, cp), lambda g, b: (g, b, 0, 0, 0)),
            pl.BlockSpec((1, k4, np_), lambda g, b: (g, 0, 0)),
            pl.BlockSpec((1, 1, np_), lambda g, b: (g, 0, 0)),
        ],
        out_specs=pl.BlockSpec((1, 1, hm * wm, np_), lambda g, b: (g, b, 0, 0)),
        compiler_params=pltpu.CompilerParams(
            dimension_semantics=("parallel", "parallel"),
            vmem_limit_bytes=32 * 1024 * 1024),
    )(xs, w_all, bias_all)


# ----------------------------------------------------------------------------
# Bilinear (align_corners=False) as precomputed matrices on the phase grid.
# ----------------------------------------------------------------------------
def _bilinear_rows(out_size, in_size):
    r = np.zeros((out_size, in_size), np.float32)
    scale = in_size / out_size
    for o in range(out_size):
        s = max((o + 0.5) * scale - 0.5, 0.0)
        i0 = min(int(np.floor(s)), in_size - 1)
        i1 = min(i0 + 1, in_size - 1)
        w1 = min(max(s - i0, 0.0), 1.0)
        r[o, i0] += 1.0 - w1
        r[o, i1] += w1
    return r


def _phase_interp_matrix(out_size, spatial):
    """(out_size, 2*spatial-1) bilinear matrix folded onto the phase grid:
    (out_size, spatial, 2); the phantom phase row/col (index 2s-1) gets zero
    weight, which subsumes the depth-to-space and the (2s-1) crop."""
    r = _bilinear_rows(out_size, 2 * spatial - 1)
    rp = np.zeros((out_size, 2 * spatial), np.float32)
    rp[:, :2 * spatial - 1] = r
    return rp.reshape(out_size, spatial, 2)


# ----------------------------------------------------------------------------
# Module: UpReconstructChannels
# ----------------------------------------------------------------------------
class UpReconstructChannels:
    """JAX/Pallas port of UpReconstructChannels (kernel_size=3, stride=2, padding=1)."""

    def __init__(self, input_channels, output_channels, kernel_size=3, stride=2,
                 padding=1, alpha=0.5, seed=0):
        assert kernel_size == 3 and stride == 2 and padding == 1, \
            "only the configuration used by GeIDN_mk3_1 is implemented"
        cin = int(input_channels * alpha)
        cout = output_channels - int(output_channels * alpha)
        self.cin, self.cout = cin, cout
        self.cin_pad = _round_up(cin, 32)          # K per tap; 4*cin_pad is 128-mult
        self.np_ = _round_up(4 * cout, 128)        # lane-dense phase axis
        key = jax.random.PRNGKey(seed)
        k1, k2, k3, k4 = jax.random.split(key, 4)
        scale = 1.0 / float(cin * kernel_size * kernel_size) ** 0.5
        self.wt1 = jax.random.uniform(k1, (cin, cout, 3, 3), jnp.float32, -scale, scale)
        self.b1 = jax.random.uniform(k2, (cout,), jnp.float32, -scale, scale)
        self.wt2 = jax.random.uniform(k3, (cin, cout, 3, 3), jnp.float32, -scale, scale)
        self.b2 = jax.random.uniform(k4, (cout,), jnp.float32, -scale, scale)
        w1, bias1 = prepare_convT_3x3_s2(self.wt1, self.b1, self.cin_pad, self.np_)
        w2, bias2 = prepare_convT_3x3_s2(self.wt2, self.b2, self.cin_pad, self.np_)
        self._w_all = jnp.stack([w1, w2])            # (2, 4*cin_pad, Np) bf16
        self._bias_all = jnp.stack([bias1, bias2])   # (2, 1, Np) f32
        self._fwd = jax.jit(self._forward)

    # TODO(synk): the bilinear resize stays as two XLA einsums on the phase
    # tensor; fusing it into the kernel needs an in-kernel (out_w, cout) ->
    # (out_w*cout) lane relayout that Mosaic does not lower cleanly.
    def _interp_phases(self, ph, out_h, out_w):
        """ph: (N, h, w, 2, 2, cout) bf16 phases -> (N, out_h, out_w, cout) f32."""
        h, w = ph.shape[1], ph.shape[2]
        rh = jnp.asarray(_phase_interp_matrix(out_h, h))   # (out_h, h, 2) f32
        rw = jnp.asarray(_phase_interp_matrix(out_w, w))   # (out_w, w, 2) f32
        t = jnp.einsum('omd,bmndec->bonec', rh, ph,
                       preferred_element_type=jnp.float32)
        return jnp.einsum('pne,bonec->bopc', rw, t,
                          preferred_element_type=jnp.float32)

    def _forward(self, x_h, x_l, match_h, match_l):
        n, h_hi, w_hi, _ = x_h.shape
        _, h_lo, w_lo, _ = x_l.shape
        hm, wm = max(h_hi, h_lo), max(w_hi, w_lo)
        cp = self.cin_pad

        def pad_branch(x):
            return jnp.pad(x.astype(jnp.bfloat16),
                           ((0, 0), (0, hm + 1 - x.shape[1]),
                            (0, wm + 1 - x.shape[2]), (0, cp - x.shape[3])))

        xs = jnp.stack([pad_branch(x_h), pad_branch(x_l)], axis=0)
        ph = conv_phases(xs, self._w_all, self._bias_all)        # (2,n,hm*wm,Np)
        ph = ph.reshape(2, n, hm, wm, self.np_)[..., :4 * self.cout]
        ph = ph.reshape(2, n, hm, wm, 2, 2, self.cout)
        y_h = self._interp_phases(ph[0, :, :h_hi, :w_hi],
                                  match_h.shape[1], match_h.shape[2])
        y_l = self._interp_phases(ph[1, :, :h_lo, :w_lo],
                                  match_l.shape[1], match_l.shape[2])
        return y_h, y_l

    def __call__(self, x, match_x):
        return self._fwd(x[0], x[1], match_x[0], match_x[1])


# ----------------------------------------------------------------------------
# Plain-JAX reference (zero-dilated conv + gather bilinear), used only to check.
# ----------------------------------------------------------------------------
def _convT_reference(x, wt, b):
    w_hwio = jnp.transpose(wt[:, :, ::-1, ::-1], (2, 3, 0, 1))  # (Kh, Kw, Cin, Cout)
    y = jax.lax.conv_general_dilated(
        x, w_hwio, window_strides=(1, 1), padding=((1, 1), (1, 1)),
        lhs_dilation=(2, 2), rhs_dilation=(1, 1),
        dimension_numbers=("NHWC", "HWIO", "NHWC"))
    return y + b[None, None, None, :]


def _interp_bilinear_reference(x, out_h, out_w):
    n, h, w, c = x.shape
    if (h, w) == (out_h, out_w):
        return x

    def src_idx(out_size, in_size):
        scale = in_size / out_size
        s = (jnp.arange(out_size, dtype=jnp.float32) + 0.5) * scale - 0.5
        s = jnp.maximum(s, 0.0)
        i0 = jnp.minimum(jnp.floor(s).astype(jnp.int32), in_size - 1)
        i1 = jnp.minimum(i0 + 1, in_size - 1)
        w1 = jnp.clip(s - i0.astype(jnp.float32), 0.0, 1.0)
        return i0, i1, w1

    y0, y1, wy = src_idx(out_h, h)
    x0, x1, wx = src_idx(out_w, w)
    r0 = jnp.take(x, y0, axis=1)
    r1 = jnp.take(x, y1, axis=1)

    def horiz(r):
        c0 = jnp.take(r, x0, axis=2)
        c1 = jnp.take(r, x1, axis=2)
        return c0 * (1 - wx)[None, None, :, None] + c1 * wx[None, None, :, None]

    top = horiz(r0)
    bot = horiz(r1)
    return top * (1 - wy)[None, :, None, None] + bot * wy[None, :, None, None]


# ----------------------------------------------------------------------------
# Main
# ----------------------------------------------------------------------------
if __name__ == "__main__":
    batch = 2
    input_channels, output_channels = 64, 64   # each branch conv: 32 -> 32 channels
    module = UpReconstructChannels(input_channels, output_channels, seed=0)

    key = jax.random.PRNGKey(0)
    k1, k2 = jax.random.split(key)
    # layout: NHWC (equivalent PyTorch NCHW inputs of shapes (2,32,8,8) and (2,32,4,4))
    x_h = jax.random.normal(k1, (batch, 8, 8, input_channels // 2), jnp.float32)
    x_l = jax.random.normal(k2, (batch, 4, 4, input_channels // 2), jnp.float32)
    match_h = jnp.zeros((batch, 16, 16, output_channels // 2), jnp.float32)
    match_l = jnp.zeros((batch, 8, 8, output_channels // 2), jnp.float32)

    y_h, y_l = module((x_h, x_l), (match_h, match_l))
    y_h, y_l = jax.block_until_ready((y_h, y_l))

    cout = output_channels - output_channels // 2
    assert y_h.shape == (batch, 16, 16, cout), y_h.shape
    assert y_l.shape == (batch, 8, 8, cout), y_l.shape
    assert bool(jnp.isfinite(y_h).all()) and bool(jnp.isfinite(y_l).all())

    # correctness: vs plain-JAX ConvTranspose2d + gather bilinear (bf16 drift only)
    r_h = _interp_bilinear_reference(_convT_reference(x_h, module.wt1, module.b1), 16, 16)
    r_l = _interp_bilinear_reference(_convT_reference(x_l, module.wt2, module.b2), 8, 8)
    err = max(float(jnp.max(jnp.abs(y_h - r_h))), float(jnp.max(jnp.abs(y_l - r_l))))
    assert err < 5e-2, f"max abs err vs reference: {err}"

    print("KERNEL_OK")
</pallas_src>

<mosaic_0001>
module attributes {stable_mosaic.version = 11 : i64} {
  func.func @_conv_phase_kernel(%arg0: i32, %arg1: i32, %arg2: memref<1x1x9x9x32xbf16, #tpu.memory_space<vmem>>, %arg3: memref<1x128x128xbf16, #tpu.memory_space<vmem>>, %arg4: memref<1x1x128xf32, #tpu.memory_space<vmem>>, %arg5: memref<1x1x64x128xbf16, #tpu.memory_space<vmem>>) attributes {dimension_semantics = [#tpu.dimension_semantics<parallel>, #tpu.dimension_semantics<parallel>], iteration_bounds = array<i64: 2, 2>, scalar_prefetch = 0 : i64, scratch_operands = 0 : i64, tpu.core_type = #tpu.core_type<tc>, window_params = [{transform_indices = @transform_0, window_bounds = array<i64: 1, 1, 9, 9, 32>}, {transform_indices = @transform_1, window_bounds = array<i64: 1, 128, 128>}, {transform_indices = @transform_2, window_bounds = array<i64: 1, 1, 128>}, {transform_indices = @transform_3, window_bounds = array<i64: 1, 1, 64, 128>}]} {
    %c0 = arith.constant 0 : index
    %c0_0 = arith.constant 0 : index
    %c0_1 = arith.constant 0 : index
    %c0_2 = arith.constant 0 : index
    %c0_3 = arith.constant 0 : index
    %0 = vector.load %arg2[%c0, %c0_0, %c0_1, %c0_2, %c0_3] : memref<1x1x9x9x32xbf16, #tpu.memory_space<vmem>>, vector<1x1x1x8x32xbf16>
    %1 = vector.shape_cast %0 : vector<1x1x1x8x32xbf16> to vector<8x32xbf16>
    %c0_4 = arith.constant 0 : index
    %c0_5 = arith.constant 0 : index
    %c1 = arith.constant 1 : index
    %c0_6 = arith.constant 0 : index
    %c0_7 = arith.constant 0 : index
    %2 = vector.load %arg2[%c0_4, %c0_5, %c1, %c0_6, %c0_7] : memref<1x1x9x9x32xbf16, #tpu.memory_space<vmem>>, vector<1x1x1x8x32xbf16>
    %3 = vector.shape_cast %2 : vector<1x1x1x8x32xbf16> to vector<8x32xbf16>
    %c0_8 = arith.constant 0 : index
    %c0_9 = arith.constant 0 : index
    %c2 = arith.constant 2 : index
    %c0_10 = arith.constant 0 : index
    %c0_11 = arith.constant 0 : index
    %4 = vector.load %arg2[%c0_8, %c0_9, %c2, %c0_10, %c0_11] : memref<1x1x9x9x32xbf16, #tpu.memory_space<vmem>>, vector<1x1x1x8x32xbf16>
    %5 = vector.shape_cast %4 : vector<1x1x1x8x32xbf16> to vector<8x32xbf16>
    %c0_12 = arith.constant 0 : index
    %c0_13 = arith.constant 0 : index
    %c3 = arith.constant 3 : index
    %c0_14 = arith.constant 0 : index
    %c0_15 = arith.constant 0 : index
    %6 = vector.load %arg2[%c0_12, %c0_13, %c3, %c0_14, %c0_15] : memref<1x1x9x9x32xbf16, #tpu.memory_space<vmem>>, vector<1x1x1x8x32xbf16>
    %7 = vector.shape_cast %6 : vector<1x1x1x8x32xbf16> to vector<8x32xbf16>
    %c0_16 = arith.constant 0 : index
    %c0_17 = arith.constant 0 : index
    %c4 = arith.constant 4 : index
    %c0_18 = arith.constant 0 : index
    %c0_19 = arith.constant 0 : index
    %8 = vector.load %arg2[%c0_16, %c0_17, %c4, %c0_18, %c0_19] : memref<1x1x9x9x32xbf16, #tpu.memory_space<vmem>>, vector<1x1x1x8x32xbf16>
    %9 = vector.shape_cast %8 : vector<1x1x1x8x32xbf16> to vector<8x32xbf16>
    %c0_20 = arith.constant 0 : index
    %c0_21 = arith.constant 0 : index
    %c5 = arith.constant 5 : index
    %c0_22 = arith.constant 0 : index
    %c0_23 = arith.constant 0 : index
    %10 = vector.load %arg2[%c0_20, %c0_21, %c5, %c0_22, %c0_23] : memref<1x1x9x9x32xbf16, #tpu.memory_space<vmem>>, vector<1x1x1x8x32xbf16>
    %11 = vector.shape_cast %10 : vector<1x1x1x8x32xbf16> to vector<8x32xbf16>
    %c0_24 = arith.constant 0 : index
    %c0_25 = arith.constant 0 : index
    %c6 = arith.constant 6 : index
    %c0_26 = arith.constant 0 : index
    %c0_27 = arith.constant 0 : index
    %12 = vector.load %arg2[%c0_24, %c0_25, %c6, %c0_26, %c0_27] : memref<1x1x9x9x32xbf16, #tpu.memory_space<vmem>>, vector<1x1x1x8x32xbf16>
    %13 = vector.shape_cast %12 : vector<1x1x1x8x32xbf16> to vector<8x32xbf16>
    %c0_28 = arith.constant 0 : index
    %c0_29 = arith.constant 0 : index
    %c7 = arith.constant 7 : index
    %c0_30 = arith.constant 0 : index
    %c0_31 = arith.constant 0 : index
    %14 = vector.load %arg2[%c0_28, %c0_29, %c7, %c0_30, %c0_31] : memref<1x1x9x9x32xbf16, #tpu.memory_space<vmem>>, vector<1x1x1x8x32xbf16>
    %15 = vector.shape_cast %14 : vector<1x1x1x8x32xbf16> to vector<8x32xbf16>
    %16 = tpu.concatenate %1, %3, %5, %7, %9, %11, %13, %15 in 0 : vector<8x32xbf16>, vector<8x32xbf16>, vector<8x32xbf16>, vector<8x32xbf16>, vector<8x32xbf16>, vector<8x32xbf16>, vector<8x32xbf16>, vector<8x32xbf16> -> vector<64x32xbf16>
    %c0_32 = arith.constant 0 : index
    %c0_33 = arith.constant 0 : index
    %c0_34 = arith.constant 0 : index
    %17 = vector.load %arg3[%c0_32, %c0_33, %c0_34] : memref<1x128x128xbf16, #tpu.memory_space<vmem>>, vector<1x32x128xbf16>
    %18 = vector.shape_cast %17 : vector<1x32x128xbf16> to vector<32x128xbf16>
    %cst = arith.constant dense<0.000000e+00> : vector<64x128xf32>
    %19 = tpu.matmul %16, %18, %cst {dimension_numbers = #tpu.dot_dimension_numbers<[1], [0], [0], [1], [0, 0, 1, 1], [], []>} : vector<64x32xbf16>, vector<32x128xbf16>, vector<64x128xf32> -> vector<64x128xf32>
    %c0_35 = arith.constant 0 : index
    %c0_36 = arith.constant 0 : index
    %c0_37 = arith.constant 0 : index
    %c1_38 = arith.constant 1 : index
    %c0_39 = arith.constant 0 : index
    %20 = vector.load %arg2[%c0_35, %c0_36, %c0_37, %c1_38, %c0_39] : memref<1x1x9x9x32xbf16, #tpu.memory_space<vmem>>, vector<1x1x1x8x32xbf16>
    %21 = vector.shape_cast %20 : vector<1x1x1x8x32xbf16> to vector<8x32xbf16>
    %c0_40 = arith.constant 0 : index
    %c0_41 = arith.constant 0 : index
    %c1_42 = arith.constant 1 : index
    %c1_43 = arith.constant 1 : index
    %c0_44 = arith.constant 0 : index
    %22 = vector.load %arg2[%c0_40, %c0_41, %c1_42, %c1_43, %c0_44] : memref<1x1x9x9x32xbf16, #tpu.memory_space<vmem>>, vector<1x1x1x8x32xbf16>
    %23 = vector.shape_cast %22 : vector<1x1x1x8x32xbf16> to vector<8x32xbf16>
    %c0_45 = arith.constant 0 : index
    %c0_46 = arith.constant 0 : index
    %c2_47 = arith.constant 2 : index
    %c1_48 = arith.constant 1 : index
    %c0_49 = arith.constant 0 : index
    %24 = vector.load %arg2[%c0_45, %c0_46, %c2_47, %c1_48, %c0_49] : memref<1x1x9x9x32xbf16, #tpu.memory_space<vmem>>, vector<1x1x1x8x32xbf16>
    %25 = vector.shape_cast %24 : vector<1x1x1x8x32xbf16> to vector<8x32xbf16>
    %c0_50 = arith.constant 0 : index
    %c0_51 = arith.constant 0 : index
    %c3_52 = arith.constant 3 : index
    %c1_53 = arith.constant 1 : index
    %c0_54 = arith.constant 0 : index
    %26 = vector.load %arg2[%c0_50, %c0_51, %c3_52, %c1_53, %c0_54] : memref<1x1x9x9x32xbf16, #tpu.memory_space<vmem>>, vector<1x1x1x8x32xbf16>
    %27 = vector.shape_cast %26 : vector<1x1x1x8x32xbf16> to vector<8x32xbf16>
    %c0_55 = arith.constant 0 : index
    %c0_56 = arith.constant 0 : index
    %c4_57 = arith.constant 4 : index
    %c1_58 = arith.constant 1 : index
    %c0_59 = arith.constant 0 : index
    %28 = vector.load %arg2[%c0_55, %c0_56, %c4_57, %c1_58, %c0_59] : memref<1x1x9x9x32xbf16, #tpu.memory_space<vmem>>, vector<1x1x1x8x32xbf16>
    %29 = vector.shape_cast %28 : vector<1x1x1x8x32xbf16> to vector<8x32xbf16>
    %c0_60 = arith.constant 0 : index
    %c0_61 = arith.constant 0 : index
    %c5_62 = arith.constant 5 : index
    %c1_63 = arith.constant 1 : index
    %c0_64 = arith.constant 0 : index
    %30 = vector.load %arg2[%c0_60, %c0_61, %c5_62, %c1_63, %c0_64] : memref<1x1x9x9x32xbf16, #tpu.memory_space<vmem>>, vector<1x1x1x8x32xbf16>
    %31 = vector.shape_cast %30 : vector<1x1x1x8x32xbf16> to vector<8x32xbf16>
    %c0_65 = arith.constant 0 : index
    %c0_66 = arith.constant 0 : index
    %c6_67 = arith.constant 6 : index
    %c1_68 = arith.constant 1 : index
    %c0_69 = arith.constant 0 : index
    %32 = vector.load %arg2[%c0_65, %c0_66, %c6_67, %c1_68, %c0_69] : memref<1x1x9x9x32xbf16, #tpu.memory_space<vmem>>, vector<1x1x1x8x32xbf16>
    %33 = vector.shape_cast %32 : vector<1x1x1x8x32xbf16> to vector<8x32xbf16>
    %c0_70 = arith.constant 0 : index
    %c0_71 = arith.constant 0 : index
    %c7_72 = arith.constant 7 : index
    %c1_73 = arith.constant 1 : index
    %c0_74 = arith.constant 0 : index
    %34 = vector.load %arg2[%c0_70, %c0_71, %c7_72, %c1_73, %c0_74] : memref<1x1x9x9x32xbf16, #tpu.memory_space<vmem>>, vector<1x1x1x8x32xbf16>
    %35 = vector.shape_cast %34 : vector<1x1x1x8x32xbf16> to vector<8x32xbf16>
    %36 = tpu.concatenate %21, %23, %25, %27, %29, %31, %33, %35 in 0 : vector<8x32xbf16>, vector<8x32xbf16>, vector<8x32xbf16>, vector<8x32xbf16>, vector<8x32xbf16>, vector<8x32xbf16>, vector<8x32xbf16>, vector<8x32xbf16> -> vector<64x32xbf16>
    %c0_75 = arith.constant 0 : index
    %c32 = arith.constant 32 : index
    %c0_76 = arith.constant 0 : index
    %37 = vector.load %arg3[%c0_75, %c32, %c0_76] : memref<1x128x128xbf16, #tpu.memory_space<vmem>>, vector<1x32x128xbf16>
    %38 = vector.shape_cast %37 : vector<1x32x128xbf16> to vector<32x128xbf16>
    %cst_77 = arith.constant dense<0.000000e+00> : vector<64x128xf32>
    %39 = tpu.matmul %36, %38, %cst_77 {dimension_numbers = #tpu.dot_dimension_numbers<[1], [0], [0], [1], [0, 0, 1, 1], [], []>} : vector<64x32xbf16>, vector<32x128xbf16>, vector<64x128xf32> -> vector<64x128xf32>
    %40 = arith.addf %19, %39 : vector<64x128xf32>
    %c0_78 = arith.constant 0 : index
    %c0_79 = arith.constant 0 : index
    %c1_80 = arith.constant 1 : index
    %c0_81 = arith.constant 0 : index
    %c0_82 = arith.constant 0 : index
    %41 = vector.load %arg2[%c0_78, %c0_79, %c1_80, %c0_81, %c0_82] : memref<1x1x9x9x32xbf16, #tpu.memory_space<vmem>>, vector<1x1x1x8x32xbf16>
    %42 = vector.shape_cast %41 : vector<1x1x1x8x32xbf16> to vector<8x32xbf16>
    %c0_83 = arith.constant 0 : index
    %c0_84 = arith.constant 0 : index
    %c2_85 = arith.constant 2 : index
    %c0_86 = arith.constant 0 : index
    %c0_87 = arith.constant 0 : index
    %43 = vector.load %arg2[%c0_83, %c0_84, %c2_85, %c0_86, %c0_87] : memref<1x1x9x9x32xbf16, #tpu.memory_space<vmem>>, vector<1x1x1x8x32xbf16>
    %44 = vector.shape_cast %43 : vector<1x1x1x8x32xbf16> to vector<8x32xbf16>
    %c0_88 = arith.constant 0 : index
    %c0_89 = arith.constant 0 : index
    %c3_90 = arith.constant 3 : index
    %c0_91 = arith.constant 0 : index
    %c0_92 = arith.constant 0 : index
    %45 = vector.load %arg2[%c0_88, %c0_89, %c3_90, %c0_91, %c0_92] : memref<1x1x9x9x32xbf16, #tpu.memory_space<vmem>>, vector<1x1x1x8x32xbf16>
    %46 = vector.shape_cast %45 : vector<1x1x1x8x32xbf16> to vector<8x32xbf16>
    %c0_93 = arith.constant 0 : index
    %c0_94 = arith.constant 0 : index
    %c4_95 = arith.constant 4 : index
    %c0_96 = arith.constant 0 : index
    %c0_97 = arith.constant 0 : index
    %47 = vector.load %arg2[%c0_93, %c0_94, %c4_95, %c0_96, %c0_97] : memref<1x1x9x9x32xbf16, #tpu.memory_space<vmem>>, vector<1x1x1x8x32xbf16>
    %48 = vector.shape_cast %47 : vector<1x1x1x8x32xbf16> to vector<8x32xbf16>
    %c0_98 = arith.constant 0 : index
    %c0_99 = arith.constant 0 : index
    %c5_100 = arith.constant 5 : index
    %c0_101 = arith.constant 0 : index
    %c0_102 = arith.constant 0 : index
    %49 = vector.load %arg2[%c0_98, %c0_99, %c5_100, %c0_101, %c0_102] : memref<1x1x9x9x32xbf16, #tpu.memory_space<vmem>>, vector<1x1x1x8x32xbf16>
    %50 = vector.shape_cast %49 : vector<1x1x1x8x32xbf16> to vector<8x32xbf16>
    %c0_103 = arith.constant 0 : index
    %c0_104 = arith.constant 0 : index
    %c6_105 = arith.constant 6 : index
    %c0_106 = arith.constant 0 : index
    %c0_107 = arith.constant 0 : index
    %51 = vector.load %arg2[%c0_103, %c0_104, %c6_105, %c0_106, %c0_107] : memref<1x1x9x9x32xbf16, #tpu.memory_space<vmem>>, vector<1x1x1x8x32xbf16>
    %52 = vector.shape_cast %51 : vector<1x1x1x8x32xbf16> to vector<8x32xbf16>
    %c0_108 = arith.constant 0 : index
    %c0_109 = arith.constant 0 : index
    %c7_110 = arith.constant 7 : index
    %c0_111 = arith.constant 0 : index
    %c0_112 = arith.constant 0 : index
    %53 = vector.load %arg2[%c0_108, %c0_109, %c7_110, %c0_111, %c0_112] : memref<1x1x9x9x32xbf16, #tpu.memory_space<vmem>>, vector<1x1x1x8x32xbf16>
    %54 = vector.shape_cast %53 : vector<1x1x1x8x32xbf16> to vector<8x32xbf16>
    %c0_113 = arith.constant 0 : index
    %c0_114 = arith.constant 0 : index
    %c8 = arith.constant 8 : index
    %c0_115 = arith.constant 0 : index
    %c0_116 = arith.constant 0 : index
    %55 = vector.load %arg2[%c0_113, %c0_114, %c8, %c0_115, %c0_116] : memref<1x1x9x9x32xbf16, #tpu.memory_space<vmem>>, vector<1x1x1x8x32xbf16>
    %56 = vector.shape_cast %55 : vector<1x1x1x8x32xbf16> to vector<8x32xbf16>
    %57 = tpu.concatenate %42, %44, %46, %48, %50, %52, %54, %56 in 0 : vector<8x32xbf16>, vector<8x32xbf16>, vector<8x32xbf16>, vector<8x32xbf16>, vector<8x32xbf16>, vector<8x32xbf16>, vector<8x32xbf16>, vector<8x32xbf16> -> vector<64x32xbf16>
    %c0_117 = arith.constant 0 : index
    %c64 = arith.constant 64 : index
    %c0_118 = arith.constant 0 : index
    %58 = vector.load %arg3[%c0_117, %c64, %c0_118] : memref<1x128x128xbf16, #tpu.memory_space<vmem>>, vector<1x32x128xbf16>
    %59 = vector.shape_cast %58 : vector<1x32x128xbf16> to vector<32x128xbf16>
    %cst_119 = arith.constant dense<0.000000e+00> : vector<64x128xf32>
    %60 = tpu.matmul %57, %59, %cst_119 {dimension_numbers = #tpu.dot_dimension_numbers<[1], [0], [0], [1], [0, 0, 1, 1], [], []>} : vector<64x32xbf16>, vector<32x128xbf16>, vector<64x128xf32> -> vector<64x128xf32>
    %61 = arith.addf %40, %60 : vector<64x128xf32>
    %c0_120 = arith.constant 0 : index
    %c0_121 = arith.constant 0 : index
    %c1_122 = arith.constant 1 : index
    %c1_123 = arith.constant 1 : index
    %c0_124 = arith.constant 0 : index
    %62 = vector.load %arg2[%c0_120, %c0_121, %c1_122, %c1_123, %c0_124] : memref<1x1x9x9x32xbf16, #tpu.memory_space<vmem>>, vector<1x1x1x8x32xbf16>
    %63 = vector.shape_cast %62 : vector<1x1x1x8x32xbf16> to vector<8x32xbf16>
    %c0_125 = arith.constant 0 : index
    %c0_126 = arith.constant 0 : index
    %c2_127 = arith.constant 2 : index
    %c1_128 = arith.constant 1 : index
    %c0_129 = arith.constant 0 : index
    %64 = vector.load %arg2[%c0_125, %c0_126, %c2_127, %c1_128, %c0_129] : memref<1x1x9x9x32xbf16, #tpu.memory_space<vmem>>, vector<1x1x1x8x32xbf16>
    %65 = vector.shape_cast %64 : vector<1x1x1x8x32xbf16> to vector<8x32xbf16>
    %c0_130 = arith.constant 0 : index
    %c0_131 = arith.constant 0 : index
    %c3_132 = arith.constant 3 : index
    %c1_133 = arith.constant 1 : index
    %c0_134 = arith.constant 0 : index
    %66 = vector.load %arg2[%c0_130, %c0_131, %c3_132, %c1_133, %c0_134] : memref<1x1x9x9x32xbf16, #tpu.memory_space<vmem>>, vector<1x1x1x8x32xbf16>
    %67 = vector.shape_cast %66 : vector<1x1x1x8x32xbf16> to vector<8x32xbf16>
    %c0_135 = arith.constant 0 : index
    %c0_136 = arith.constant 0 : index
    %c4_137 = arith.constant 4 : index
    %c1_138 = arith.constant 1 : index
    %c0_139 = arith.constant 0 : index
    %68 = vector.load %arg2[%c0_135, %c0_136, %c4_137, %c1_138, %c0_139] : memref<1x1x9x9x32xbf16, #tpu.memory_space<vmem>>, vector<1x1x1x8x32xbf16>
    %69 = vector.shape_cast %68 : vector<1x1x1x8x32xbf16> to vector<8x32xbf16>
    %c0_140 = arith.constant 0 : index
    %c0_141 = arith.constant 0 : index
    %c5_142 = arith.constant 5 : index
    %c1_143 = arith.constant 1 : index
    %c0_144 = arith.constant 0 : index
    %70 = vector.load %arg2[%c0_140, %c0_141, %c5_142, %c1_143, %c0_144] : memref<1x1x9x9x32xbf16, #tpu.memory_space<vmem>>, vector<1x1x1x8x32xbf16>
    %71 = vector.shape_cast %70 : vector<1x1x1x8x32xbf16> to vector<8x32xbf16>
    %c0_145 = arith.constant 0 : index
    %c0_146 = arith.constant 0 : index
    %c6_147 = arith.constant 6 : index
    %c1_148 = arith.constant 1 : index
    %c0_149 = arith.constant 0 : index
    %72 = vector.load %arg2[%c0_145, %c0_146, %c6_147, %c1_148, %c0_149] : memref<1x1x9x9x32xbf16, #tpu.memory_space<vmem>>, vector<1x1x1x8x32xbf16>
    %73 = vector.shape_cast %72 : vector<1x1x1x8x32xbf16> to vector<8x32xbf16>
    %c0_150 = arith.constant 0 : index
    %c0_151 = arith.constant 0 : index
    %c7_152 = arith.constant 7 : index
    %c1_153 = arith.constant 1 : index
    %c0_154 = arith.constant 0 : index
    %74 = vector.load %arg2[%c0_150, %c0_151, %c7_152, %c1_153, %c0_154] : memref<1x1x9x9x32xbf16, #tpu.memory_space<vmem>>, vector<1x1x1x8x32xbf16>
    %75 = vector.shape_cast %74 : vector<1x1x1x8x32xbf16> to vector<8x32xbf16>
    %c0_155 = arith.constant 0 : index
    %c0_156 = arith.constant 0 : index
    %c8_157 = arith.constant 8 : index
    %c1_158 = arith.constant 1 : index
    %c0_159 = arith.constant 0 : index
    %76 = vector.load %arg2[%c0_155, %c0_156, %c8_157, %c1_158, %c0_159] : memref<1x1x9x9x32xbf16, #tpu.memory_space<vmem>>, vector<1x1x1x8x32xbf16>
    %77 = vector.shape_cast %76 : vector<1x1x1x8x32xbf16> to vector<8x32xbf16>
    %78 = tpu.concatenate %63, %65, %67, %69, %71, %73, %75, %77 in 0 : vector<8x32xbf16>, vector<8x32xbf16>, vector<8x32xbf16>, vector<8x32xbf16>, vector<8x32xbf16>, vector<8x32xbf16>, vector<8x32xbf16>, vector<8x32xbf16> -> vector<64x32xbf16>
    %c0_160 = arith.constant 0 : index
    %c96 = arith.constant 96 : index
    %c0_161 = arith.constant 0 : index
    %79 = vector.load %arg3[%c0_160, %c96, %c0_161] : memref<1x128x128xbf16, #tpu.memory_space<vmem>>, vector<1x32x128xbf16>
    %80 = vector.shape_cast %79 : vector<1x32x128xbf16> to vector<32x128xbf16>
    %cst_162 = arith.constant dense<0.000000e+00> : vector<64x128xf32>
    %81 = tpu.matmul %78, %80, %cst_162 {dimension_numbers = #tpu.dot_dimension_numbers<[1], [0], [0], [1], [0, 0, 1, 1], [], []>} : vector<64x32xbf16>, vector<32x128xbf16>, vector<64x128xf32> -> vector<64x128xf32>
    %82 = arith.addf %61, %81 : vector<64x128xf32>
    %c0_163 = arith.constant 0 : index
    %c0_164 = arith.constant 0 : index
    %c0_165 = arith.constant 0 : index
    %83 = vector.load %arg4[%c0_163, %c0_164, %c0_165] : memref<1x1x128xf32, #tpu.memory_space<vmem>>, vector<1x1x128xf32>
    %84 = vector.shape_cast %83 : vector<1x1x128xf32> to vector<1x128xf32>
    %85 = vector.broadcast %84 : vector<1x128xf32> to vector<64x128xf32>
    %86 = arith.addf %82, %85 : vector<64x128xf32>
    %87 = arith.truncf %86 : vector<64x128xf32> to vector<64x128xbf16>
    %c0_166 = arith.constant 0 : index
    %c0_167 = arith.constant 0 : index
    %c0_168 = arith.constant 0 : index
    %c0_169 = arith.constant 0 : index
    %88 = vector.load %arg5[%c0_166, %c0_167, %c0_168, %c0_169] : memref<1x1x64x128xbf16, #tpu.memory_space<vmem>>, vector<1x1x64x128xbf16>
    %89 = vector.shape_cast %88 : vector<1x1x64x128xbf16> to vector<64x128xbf16>
    %90 = vector.shape_cast %87 : vector<64x128xbf16> to vector<1x1x64x128xbf16>
    tpu.vector_store %arg5[%c0_166, %c0_167, %c0_168, %c0_169], %90 {strides = array<i32>} : memref<1x1x64x128xbf16, #tpu.memory_space<vmem>>, vector<1x1x64x128xbf16>,
    return
  }
  func.func @transform_0(%arg0: i32, %arg1: i32) -> (i32, i32, i32, i32, i32) {
    %c0_i32 = arith.constant 0 : i32
    %c0_i32_0 = arith.constant 0 : i32
    %c0_i32_1 = arith.constant 0 : i32
    %c0_i32_2 = arith.constant 0 : i32
    return %arg0, %arg1, %c0_i32, %c0_i32_0, %c0_i32_1 : i32, i32, i32, i32, i32
  }
  func.func @transform_1(%arg0: i32, %arg1: i32) -> (i32, i32, i32) {
    %c0_i32 = arith.constant 0 : i32
    %c0_i32_0 = arith.constant 0 : i32
    %c0_i32_1 = arith.constant 0 : i32
    return %arg0, %c0_i32, %c0_i32_0 : i32, i32, i32
  }
  func.func @transform_2(%arg0: i32, %arg1: i32) -> (i32, i32, i32) {
    %c0_i32 = arith.constant 0 : i32
    %c0_i32_0 = arith.constant 0 : i32
    %c0_i32_1 = arith.constant 0 : i32
    return %arg0, %c0_i32, %c0_i32_0 : i32, i32, i32
  }
  func.func @transform_3(%arg0: i32, %arg1: i32) -> (i32, i32, i32, i32) {
    %c0_i32 = arith.constant 0 : i32
    %c0_i32_0 = arith.constant 0 : i32
    %c0_i32_1 = arith.constant 0 : i32
    return %arg0, %arg1, %c0_i32, %c0_i32_0 : i32, i32, i32, i32
  }
}

</mosaic_0001>

<bundles_post_ra>
// kernel: squeeze.2
= control target key start
LH: loop header
LB: loop body
LE: loop exit
PB: predicated region body
PF: predicated region fallthrough
CT: control target
= control target key end

     0   :  { %s3258_s18 = smov 96   ;;  %vm243_vm0 = vcmask 261120   ;;  %s3260_s23 = smov 32   ;;  %s4477_s0 = inlined_call_operand.vmem [shape: bf16[1,2,64,128], index: 0, kind: input, shape index: {}]   ;;  %s4478_s1 = inlined_call_operand.vmem [shape: bf16[2,8,8,2,2,32], index: 1, kind: output, shape index: {}]  }
   0x1   :  { %v3125_v0 = vld [vmem:[%s4477_s0] sm:$0xff]   ;;  %v3133_v1 = vld [vmem:[%s4477_s0 + $0x10] sm:$0xff]   ;;  %v3134_v6 = vld [vmem:[%s4477_s0 + $0x8] sm:$0xff]  }
   0x2   :  { %v3126_v2 = vunpack.c.l.bf16 %v3125_v0  ;;  %v3277_v3 = vunpack.c.h.bf16 %v3125_v0  ;;  %v3279_v4 = vunpack.c.l.bf16 %v3133_v1  ;;  %v3281_v5 = vunpack.c.h.bf16 %v3133_v1  ;;  %v3131_v7 = vld [vmem:[%s4477_s0 + $0x20] sm:$0xff]   ;;  %v3132_v8 = vld [vmem:[%s4477_s0 + $0x18] sm:$0xff]   ;;  %v3130_v14 = vld [vmem:[%s4477_s0 + $0x28] sm:$0xff]  }
   0x3   :  { %v3110_v11 = vunpack.c.l.bf16 %v3131_v7  ;;  %v3111_v12 = vunpack.c.h.bf16 %v3131_v7  ;;  %v3122_v13 = vunpack.c.l.bf16 %v3134_v6  ;;  %v3123_v15 = vunpack.c.h.bf16 %v3134_v6  ;;  %v3129_v23 = vld [vmem:[%s4477_s0 + $0x30] sm:$0xff]   ;;  %v3128_v24 = vld [vmem:[%s4477_s0 + $0x38] sm:$0xff]   ;;  %s3259_s0 = smov 64  }
   0x4   :  { %v3138_v9 = vpack.i.bf16 %v3277_v3, %v3126_v2  ;;  %v3295_v10 = vpack.i.bf16 %v3281_v5, %v3279_v4  ;;  %v3301_v16 = vunpack.c.l.bf16 %v3132_v8  ;;  %v3303_v17 = vunpack.c.h.bf16 %v3132_v8  ;;  %244 = vst.msk [vmem:[#allocation0] ss:$16 sm:$0x3] %vm243_vm0, %v3126_v2  }
   0x5   :  { %v3158_v18 = vpack.i.bf16 %v3111_v12, %v3110_v11  ;;  %v3305_v19 = vunpack.c.l.bf16 %v3130_v14  ;;  %v3307_v20 = vunpack.c.h.bf16 %v3130_v14  ;;  %v3143_v21 = vpack.i.bf16 %v3123_v15, %v3122_v13  ;;  %340 = vst.msk [vmem:[#allocation0 + $0x480] ss:$16 sm:$0x3] %vm243_vm0, %v3111_v12  }
   0x6   :  { %3139 = vrot.lane.b32.xlu0 %v3138_v9, %s3258_s18  ;;  %3149 = vrot.lane.b32.xlu1 %v3295_v10, %s3258_s18  ;;  %v3153_v22 = vpack.i.bf16 %v3303_v17, %v3301_v16  ;;  %v3319_v26 = vunpack.c.l.bf16 %v3129_v23  ;;  %v3321_v27 = vunpack.c.h.bf16 %v3129_v23  ;;  %v3323_v28 = vunpack.c.l.bf16 %v3128_v24  ;;  %342 = vst.msk [vmem:[#allocation0 + $0x480] ss:$16 sm:$0xc] %vm243_vm0, %v3111_v12  }
   0x7   :  { %3159 = vrot.lane.b32.xlu2 %v3158_v18, %s3258_s18  ;;  %v3163_v25 = vpack.i.bf16 %v3307_v20, %v3305_v19  ;;  %v3325_v29 = vunpack.c.h.bf16 %v3128_v24  ;;  %344 = vst.msk [vmem:[#allocation0 + $0x480] ss:$16 sm:$0x30] %vm243_vm0, %v3111_v12  }
   0x8   :  { %v3168_v30 = vpack.i.bf16 %v3321_v27, %v3319_v26  ;;  %346 = vst.msk [vmem:[#allocation0 + $0x480] ss:$16 sm:$0xc0] %vm243_vm0, %v3111_v12  }
   0x9   :  { %v3173_v31 = vpack.i.bf16 %v3325_v29, %v3323_v28  ;;  %329 = vst.msk [vmem:[#allocation0 + $0x400] ss:$16 sm:$0x3] %vm243_vm0, %v3110_v11  }
   0xa   :  { %331 = vst.msk [vmem:[#allocation0 + $0x400] ss:$16 sm:$0xc] %vm243_vm0, %v3110_v11  }
   0xb   :  { %333 = vst.msk [vmem:[#allocation0 + $0x400] ss:$16 sm:$0x30] %vm243_vm0, %v3110_v11  }
   0xc   :  { %335 = vst.msk [vmem:[#allocation0 + $0x400] ss:$16 sm:$0xc0] %vm243_vm0, %v3110_v11  }
   0xd   :  { %245 = vst.msk [vmem:[#allocation0] ss:$16 sm:$0xc] %vm243_vm0, %v3126_v2  }
   0xe   :  { %3144 = vrot.lane.b32.xlu0 %v3143_v21, %s3258_s18  ;;  %3154 = vrot.lane.b32.xlu1 %v3153_v22, %s3258_s18  ;;  %246 = vst.msk [vmem:[#allocation0] ss:$16 sm:$0x30] %vm243_vm0, %v3126_v2  }
   0xf   :  { %3164 = vrot.lane.b32.xlu2 %v3163_v25, %s3258_s18  ;;  %247 = vst.msk [vmem:[#allocation0] ss:$16 sm:$0xc0] %vm243_vm0, %v3126_v2  }
  0x10   :  { %252 = vst.msk [vmem:[#allocation0 + $0x80] ss:$16 sm:$0x3] %vm243_vm0, %v3277_v3  }
  0x11   :  { %254 = vst.msk [vmem:[#allocation0 + $0x80] ss:$16 sm:$0xc] %vm243_vm0, %v3277_v3  }
  0x12   :  { %256 = vst.msk [vmem:[#allocation0 + $0x80] ss:$16 sm:$0x30] %vm243_vm0, %v3277_v3  }
  0x13   :  { %258 = vst.msk [vmem:[#allocation0 + $0x80] ss:$16 sm:$0xc0] %vm243_vm0, %v3277_v3  }
  0x14   :  { %263 = vst.msk [vmem:[#allocation0 + $0x100] ss:$16 sm:$0x3] %vm243_vm0, %v3122_v13  }
  0x15   :  { %265 = vst.msk [vmem:[#allocation0 + $0x100] ss:$16 sm:$0xc] %vm243_vm0, %v3122_v13  }
  0x16   :  { %3169 = vrot.lane.b32.xlu0 %v3168_v30, %s3258_s18  ;;  %3174 = vrot.lane.b32.xlu1 %v3173_v31, %s3258_s18  ;;  %267 = vst.msk [vmem:[#allocation0 + $0x100] ss:$16 sm:$0x30] %vm243_vm0, %v3122_v13  }
  0x17   :  { %3179 = vrot.lane.b32.xlu2 %v3138_v9, %s3259_s0  ;;  %269 = vst.msk [vmem:[#allocation0 + $0x100] ss:$16 sm:$0xc0] %vm243_vm0, %v3122_v13  }
  0x18   :  { %274 = vst.msk [vmem:[#allocation0 + $0x180] ss:$16 sm:$0x3] %vm243_vm0, %v3123_v15  }
  0x19   :  { %276 = vst.msk [vmem:[#allocation0 + $0x180] ss:$16 sm:$0xc] %vm243_vm0, %v3123_v15  }
  0x1a   :  { %278 = vst.msk [vmem:[#allocation0 + $0x180] ss:$16 sm:$0x30] %vm243_vm0, %v3123_v15  }
  0x1b   :  { %280 = vst.msk [vmem:[#allocation0 + $0x180] ss:$16 sm:$0xc0] %vm243_vm0, %v3123_v15  }
  0x1c   :  { %285 = vst.msk [vmem:[#allocation0 + $0x200] ss:$16 sm:$0x3] %vm243_vm0, %v3279_v4  }
  0x1d   :  { %287 = vst.msk [vmem:[#allocation0 + $0x200] ss:$16 sm:$0xc] %vm243_vm0, %v3279_v4  }
  0x1e   :  { %3184 = vrot.lane.b32.xlu0 %v3143_v21, %s3259_s0  ;;  %3189 = vrot.lane.b32.xlu1 %v3295_v10, %s3259_s0  ;;  %289 = vst.msk [vmem:[#allocation0 + $0x200] ss:$16 sm:$0x30] %vm243_vm0, %v3279_v4  }
  0x1f   :  { %3194 = vrot.lane.b32.xlu2 %v3153_v22, %s3259_s0  ;;  %291 = vst.msk [vmem:[#allocation0 + $0x200] ss:$16 sm:$0xc0] %vm243_vm0, %v3279_v4  }
  0x20   :  { %296 = vst.msk [vmem:[#allocation0 + $0x280] ss:$16 sm:$0x3] %vm243_vm0, %v3281_v5  }
  0x21   :  { %298 = vst.msk [vmem:[#allocation0 + $0x280] ss:$16 sm:$0xc] %vm243_vm0, %v3281_v5  }
  0x22   :  { %300 = vst.msk [vmem:[#allocation0 + $0x280] ss:$16 sm:$0x30] %vm243_vm0, %v3281_v5  }
  0x23   :  { %302 = vst.msk [vmem:[#allocation0 + $0x280] ss:$16 sm:$0xc0] %vm243_vm0, %v3281_v5  }
  0x24   :  { %307 = vst.msk [vmem:[#allocation0 + $0x300] ss:$16 sm:$0x3] %vm243_vm0, %v3301_v16  }
  0x25   :  { %309 = vst.msk [vmem:[#allocation0 + $0x300] ss:$16 sm:$0xc] %vm243_vm0, %v3301_v16  }
  0x26   :  { %3199 = vrot.lane.b32.xlu0 %v3158_v18, %s3259_s0  ;;  %3204 = vrot.lane.b32.xlu1 %v3163_v25, %s3259_s0  ;;  %311 = vst.msk [vmem:[#allocation0 + $0x300] ss:$16 sm:$0x30] %vm243_vm0, %v3301_v16  }
  0x27   :  { %3209 = vrot.lane.b32.xlu2 %v3168_v30, %s3259_s0  ;;  %313 = vst.msk [vmem:[#allocation0 + $0x300] ss:$16 sm:$0xc0] %vm243_vm0, %v3301_v16  }
  0x28   :  { %318 = vst.msk [vmem:[#allocation0 + $0x380] ss:$16 sm:$0x3] %vm243_vm0, %v3303_v17  }
  0x29   :  { %320 = vst.msk [vmem:[#allocation0 + $0x380] ss:$16 sm:$0xc] %vm243_vm0, %v3303_v17  }
  0x2a   :  { %322 = vst.msk [vmem:[#allocation0 + $0x380] ss:$16 sm:$0x30] %vm243_vm0, %v3303_v17  }
  0x2b   :  { %324 = vst.msk [vmem:[#allocation0 + $0x380] ss:$16 sm:$0xc0] %vm243_vm0, %v3303_v17  }
  0x2c   :  { %351 = vst.msk [vmem:[#allocation0 + $0x500] ss:$16 sm:$0x3] %vm243_vm0, %v3305_v19  }
  0x2d   :  { %353 = vst.msk [vmem:[#allocation0 + $0x500] ss:$16 sm:$0xc] %vm243_vm0, %v3305_v19  }
  0x2e   :  { %3214 = vrot.lane.b32.xlu0 %v3173_v31, %s3259_s0  ;;  %3219 = vrot.lane.b32.xlu1 %v3138_v9, %s3260_s23  ;;  %355 = vst.msk [vmem:[#allocation0 + $0x500] ss:$16 sm:$0x30] %vm243_vm0, %v3305_v19  }
  0x2f   :  { %3224 = vrot.lane.b32.xlu2 %v3143_v21, %s3260_s23  ;;  %357 = vst.msk [vmem:[#allocation0 + $0x500] ss:$16 sm:$0xc0] %vm243_vm0, %v3305_v19  }
  0x30   :  { %362 = vst.msk [vmem:[#allocation0 + $0x580] ss:$16 sm:$0x3] %vm243_vm0, %v3307_v20  }
  0x31   :  { %364 = vst.msk [vmem:[#allocation0 + $0x580] ss:$16 sm:$0xc] %vm243_vm0, %v3307_v20  }
  0x32   :  { %366 = vst.msk [vmem:[#allocation0 + $0x580] ss:$16 sm:$0x30] %vm243_vm0, %v3307_v20  }
  0x33   :  { %368 = vst.msk [vmem:[#allocation0 + $0x580] ss:$16 sm:$0xc0] %vm243_vm0, %v3307_v20  }
  0x34   :  { %373 = vst.msk [vmem:[#allocation0 + $0x600] ss:$16 sm:$0x3] %vm243_vm0, %v3319_v26  }
  0x35   :  { %375 = vst.msk [vmem:[#allocation0 + $0x600] ss:$16 sm:$0xc] %vm243_vm0, %v3319_v26  }
  0x36   :  { %3229 = vrot.lane.b32.xlu0 %v3295_v10, %s3260_s23  ;;  %3234 = vrot.lane.b32.xlu1 %v3153_v22, %s3260_s23  ;;  %377 = vst.msk [vmem:[#allocation0 + $0x600] ss:$16 sm:$0x30] %vm243_vm0, %v3319_v26  }
  0x37   :  { %3239 = vrot.lane.b32.xlu2 %v3158_v18, %s3260_s23  ;;  %379 = vst.msk [vmem:[#allocation0 + $0x600] ss:$16 sm:$0xc0] %vm243_vm0, %v3319_v26  }
  0x38   :  { %384 = vst.msk [vmem:[#allocation0 + $0x680] ss:$16 sm:$0x3] %vm243_vm0, %v3321_v27  }
  0x39   :  { %386 = vst.msk [vmem:[#allocation0 + $0x680] ss:$16 sm:$0xc] %vm243_vm0, %v3321_v27  }
  0x3a   :  { %388 = vst.msk [vmem:[#allocation0 + $0x680] ss:$16 sm:$0x30] %vm243_vm0, %v3321_v27  }
  0x3b   :  { %390 = vst.msk [vmem:[#allocation0 + $0x680] ss:$16 sm:$0xc0] %vm243_vm0, %v3321_v27  }
  0x3c   :  { %395 = vst.msk [vmem:[#allocation0 + $0x700] ss:$16 sm:$0x3] %vm243_vm0, %v3323_v28  }
  0x3d   :  { %397 = vst.msk [vmem:[#allocation0 + $0x700] ss:$16 sm:$0xc] %vm243_vm0, %v3323_v28  }
  0x3e   :  { %3244 = vrot.lane.b32.xlu0 %v3163_v25, %s3260_s23  ;;  %3249 = vrot.lane.b32.xlu1 %v3168_v30, %s3260_s23  ;;  %399 = vst.msk [vmem:[#allocation0 + $0x700] ss:$16 sm:$0x30] %vm243_vm0, %v3323_v28  }
  0x3f   :  { %3254 = vrot.lane.b32.xlu2 %v3173_v31, %s3260_s23  ;;  %401 = vst.msk [vmem:[#allocation0 + $0x700] ss:$16 sm:$0xc0] %vm243_vm0, %v3323_v28  }
  0x40   :  { %406 = vst.msk [vmem:[#allocation0 + $0x780] ss:$16 sm:$0x3] %vm243_vm0, %v3325_v29  }
  0x41   :  { %408 = vst.msk [vmem:[#allocation0 + $0x780] ss:$16 sm:$0xc] %vm243_vm0, %v3325_v29  }
  0x42   :  { %410 = vst.msk [vmem:[#allocation0 + $0x780] ss:$16 sm:$0x30] %vm243_vm0, %v3325_v29  }
  0x43   :  { %412 = vst.msk [vmem:[#allocation0 + $0x780] ss:$16 sm:$0xc0] %vm243_vm0, %v3325_v29  }
  0x61   :  { %v3160_v32 = vpop.permute.xlu2 %3159 }
  0x62   :  { %v3162_v33 = vunpack.i.h.bf16 %v3160_v32  ;;  %v3161_v34 = vunpack.i.l.bf16 %v3160_v32 }
  0x64   :  { %535 = vst.msk [vmem:[#allocation0 + $0x481] ss:$16 sm:$0x3] %vm243_vm0, %v3162_v33  }
  0x65   :  { %537 = vst.msk [vmem:[#allocation0 + $0x481] ss:$16 sm:$0xc] %vm243_vm0, %v3162_v33  }
  0x66   :  { %539 = vst.msk [vmem:[#allocation0 + $0x481] ss:$16 sm:$0x30] %vm243_vm0, %v3162_v33  }
  0x67   :  { %541 = vst.msk [vmem:[#allocation0 + $0x481] ss:$16 sm:$0xc0] %vm243_vm0, %v3162_v33  }
  0x68   :  { %522 = vst.msk [vmem:[#allocation0 + $0x401] ss:$16 sm:$0x3] %vm243_vm0, %v3161_v34  }
  0x69   :  { %524 = vst.msk [vmem:[#allocation0 + $0x401] ss:$16 sm:$0xc] %vm243_vm0, %v3161_v34   ;;  %v3165_v35 = vpop.permute.xlu2 %3164 }
  0x6a   :  { %526 = vst.msk [vmem:[#allocation0 + $0x401] ss:$16 sm:$0x30] %vm243_vm0, %v3161_v34   ;;  %v3167_v1 = vunpack.i.h.bf16 %v3165_v35  ;;  %v3166_v6 = vunpack.i.l.bf16 %v3165_v35 }
  0x6b   :  { %v2043_v36 = vld [vmem:[#allocation0 + $0x480] sm:$0x3]  ;;  %v2057_v37 = vld [vmem:[#allocation0 + $0x490] sm:$0x3] }
  0x6c   :  { %v2044_v38 = vpack.c.bf16 0.0, %v2043_v36  ;;  %v2058_v39 = vpack.c.bf16 0.0, %v2057_v37  ;;  %v2071_v40 = vld [vmem:[#allocation0 + $0x4a0] sm:$0x3]  ;;  %v2085_v41 = vld [vmem:[#allocation0 + $0x4b0] sm:$0x3] }
  0x6d   :  { %v2072_v42 = vpack.c.bf16 0.0, %v2071_v40  ;;  %v2086_v43 = vpack.c.bf16 0.0, %v2085_v41  ;;  %v2099_v44 = vld [vmem:[#allocation0 + $0x4c0] sm:$0x3]  ;;  %v2113_v45 = vld [vmem:[#allocation0 + $0x4d0] sm:$0x3] }
  0x6e   :  { %2984 = vst [vmem:[%s4478_s1 + $0x90] sm:$0x1] %v2044_v38  ;;  %v2100_v46 = vpack.c.bf16 0.0, %v2099_v44  ;;  %v2127_v47 = vld [vmem:[#allocation0 + $0x4e0] sm:$0x3]  ;;  %v2114_v48 = vpack.c.bf16 0.0, %v2113_v45 }
  0x6f   :  { %2986 = vst [vmem:[%s4478_s1 + $0x92] sm:$0x1] %v2058_v39  ;;  %v2141_v49 = vld [vmem:[#allocation0 + $0x4f0] sm:$0x3]  ;;  %v2128_v50 = vpack.c.bf16 0.0, %v2127_v47 }
  0x70   :  { %2988 = vst [vmem:[%s4478_s1 + $0x94] sm:$0x1] %v2072_v42  ;;  %v1931_v51 = vld [vmem:[#allocation0 + $0x400] sm:$0x3]  ;;  %v2142_v52 = vpack.c.bf16 0.0, %v2141_v49 }
  0x71   :  { %2990 = vst [vmem:[%s4478_s1 + $0x96] sm:$0x1] %v2086_v43  ;;  %v1945_v53 = vld [vmem:[#allocation0 + $0x410] sm:$0x3]  ;;  %v1959_v54 = vld [vmem:[#allocation0 + $0x420] sm:$0x3] }
  0x72   :  { %2992 = vst [vmem:[%s4478_s1 + $0x98] sm:$0x1] %v2100_v46  ;;  %v1932_v55 = vpack.c.bf16 0.0, %v1931_v51  ;;  %v1973_v56 = vld [vmem:[#allocation0 + $0x430] sm:$0x3]  ;;  %v1946_v57 = vpack.c.bf16 0.0, %v1945_v53 }
  0x73   :  { %2994 = vst [vmem:[%s4478_s1 + $0x9a] sm:$0x1] %v2114_v48  ;;  %v1987_v58 = vld [vmem:[#allocation0 + $0x440] sm:$0x3]  ;;  %v1960_v59 = vpack.c.bf16 0.0, %v1959_v54  ;;  %v1974_v61 = vpack.c.bf16 0.0, %v1973_v56 }
  0x74   :  { %2996 = vst [vmem:[%s4478_s1 + $0x9c] sm:$0x1] %v2128_v50  ;;  %v2001_v60 = vld [vmem:[#allocation0 + $0x450] sm:$0x3]  ;;  %v1988_v62 = vpack.c.bf16 0.0, %v1987_v58  ;;  %v3580_v58 = vpop.permute.xlu2 %3179 }
  0x75   :  { %2998 = vst [vmem:[%s4478_s1 + $0x9e] sm:$0x1] %v2142_v52  ;;  %v2002_v0 = vpack.c.bf16 0.0, %v2001_v60 }
  0x76   :  { %528 = vst.msk [vmem:[#allocation0 + $0x401] ss:$16 sm:$0xc0] %vm243_vm0, %v3161_v34  }
  0x77   :  { %2968 = vst [vmem:[%s4478_s1 + $0x80] sm:$0x1] %v1932_v55 }
  0x78   :  { %v3476_v63 = vpop.permute.xlu0 %3139  ;;  %2970 = vst [vmem:[%s4478_s1 + $0x82] sm:$0x1] %v1946_v57  ;;  %v3520_v24 = vpop.permute.xlu1 %3149 }
  0x79   :  { %2972 = vst [vmem:[%s4478_s1 + $0x84] sm:$0x1] %v1960_v59  ;;  %v3142_v32 = vunpack.i.h.bf16 %v3476_v63  ;;  %v3141_v45 = vunpack.i.l.bf16 %v3476_v63  ;;  %v3152_v63 = vunpack.i.h.bf16 %v3520_v24 }
  0x7a   :  { %2974 = vst [vmem:[%s4478_s1 + $0x86] sm:$0x1] %v1974_v61 }
  0x7b   :  { %2976 = vst [vmem:[%s4478_s1 + $0x88] sm:$0x1] %v1988_v62 }
  0x7c   :  { %2978 = vst [vmem:[%s4478_s1 + $0x8a] sm:$0x1] %v2002_v0 }
  0x7d   :  { %v2015_v2 = vld [vmem:[#allocation0 + $0x460] sm:$0x3]  ;;  %v2029_v3 = vld [vmem:[#allocation0 + $0x470] sm:$0x3] }
  0x7e   :  { %v2016_v4 = vpack.c.bf16 0.0, %v2015_v2  ;;  %v2030_v5 = vpack.c.bf16 0.0, %v2029_v3  ;;  %561 = vst.msk [vmem:[#allocation0 + $0x581] ss:$16 sm:$0x3] %vm243_vm0, %v3167_v1  }
  0x7f   :  { %563 = vst.msk [vmem:[#allocation0 + $0x581] ss:$16 sm:$0xc] %vm243_vm0, %v3167_v1  }
  0x80   :  { %2980 = vst [vmem:[%s4478_s1 + $0x8c] sm:$0x1] %v2016_v4  ;;  %v3601_v4 = vpop.permute.xlu0 %3144 }
  0x81   :  { %2982 = vst [vmem:[%s4478_s1 + $0x8e] sm:$0x1] %v2030_v5 }
  0x82   :  { %565 = vst.msk [vmem:[#allocation0 + $0x581] ss:$16 sm:$0x30] %vm243_vm0, %v3167_v1  }
  0x83   :  { %567 = vst.msk [vmem:[#allocation0 + $0x581] ss:$16 sm:$0xc0] %vm243_vm0, %v3167_v1  }
  0x84   :  { %548 = vst.msk [vmem:[#allocation0 + $0x501] ss:$16 sm:$0x3] %vm243_vm0, %v3166_v6  }
  0x85   :  { %v2267_v7 = vld [vmem:[#allocation0 + $0x580] sm:$0x3]  ;;  %v2281_v8 = vld [vmem:[#allocation0 + $0x590] sm:$0x3] }
  0x86   :  { %v2268_v9 = vpack.c.bf16 0.0, %v2267_v7  ;;  %v2282_v10 = vpack.c.bf16 0.0, %v2281_v8  ;;  %v2295_v11 = vld [vmem:[#allocation0 + $0x5a0] sm:$0x3]  ;;  %v2309_v12 = vld [vmem:[#allocation0 + $0x5b0] sm:$0x3] }
  0x87   :  { %v2296_v13 = vpack.c.bf16 0.0, %v2295_v11  ;;  %v2310_v14 = vpack.c.bf16 0.0, %v2309_v12  ;;  %550 = vst.msk [vmem:[#allocation0 + $0x501] ss:$16 sm:$0xc] %vm243_vm0, %v3166_v6  }
  0x88   :  { %3016 = vst [vmem:[%s4478_s1 + $0xb0] sm:$0x1] %v2268_v9 }
  0x89   :  { %3018 = vst [vmem:[%s4478_s1 + $0xb2] sm:$0x1] %v2282_v10  ;;  %v2323_v15 = vld [vmem:[#allocation0 + $0x5c0] sm:$0x3]  ;;  %v2337_v16 = vld [vmem:[#allocation0 + $0x5d0] sm:$0x3] }
  0x8a   :  { %3020 = vst [vmem:[%s4478_s1 + $0xb4] sm:$0x1] %v2296_v13  ;;  %v2324_v17 = vpack.c.bf16 0.0, %v2323_v15  ;;  %v2338_v18 = vpack.c.bf16 0.0, %v2337_v16  ;;  %v2351_v19 = vld [vmem:[#allocation0 + $0x5e0] sm:$0x3] }
  0x8b   :  { %3022 = vst [vmem:[%s4478_s1 + $0xb6] sm:$0x1] %v2310_v14  ;;  %v2352_v20 = vpack.c.bf16 0.0, %v2351_v19  ;;  %v2365_v21 = vld [vmem:[#allocation0 + $0x5f0] sm:$0x3] }
  0x8c   :  { %3024 = vst [vmem:[%s4478_s1 + $0xb8] sm:$0x1] %v2324_v17  ;;  %v2366_v22 = vpack.c.bf16 0.0, %v2365_v21  ;;  %v2155_v23 = vld [vmem:[#allocation0 + $0x500] sm:$0x3]  ;;  %v3151_v17 = vunpack.i.l.bf16 %v3520_v24 }
  0x8d   :  { %3026 = vst [vmem:[%s4478_s1 + $0xba] sm:$0x1] %v2338_v18  ;;  %v2169_v25 = vld [vmem:[#allocation0 + $0x510] sm:$0x3]  ;;  %v2156_v26 = vpack.c.bf16 0.0, %v2155_v23 }
  0x8e   :  { %3028 = vst [vmem:[%s4478_s1 + $0xbc] sm:$0x1] %v2352_v20  ;;  %v2183_v27 = vld [vmem:[#allocation0 + $0x520] sm:$0x3]  ;;  %v2170_v28 = vpack.c.bf16 0.0, %v2169_v25 }
  0x8f   :  { %3030 = vst [vmem:[%s4478_s1 + $0xbe] sm:$0x1] %v2366_v22  ;;  %v2197_v29 = vld [vmem:[#allocation0 + $0x530] sm:$0x3]  ;;  %v2184_v30 = vpack.c.bf16 0.0, %v2183_v27 }
  0x90   :  { %552 = vst.msk [vmem:[#allocation0 + $0x501] ss:$16 sm:$0x30] %vm243_vm0, %v3166_v6   ;;  %v2198_v31 = vpack.c.bf16 0.0, %v2197_v29 }
  0x91   :  { %554 = vst.msk [vmem:[#allocation0 + $0x501] ss:$16 sm:$0xc0] %vm243_vm0, %v3166_v6  }
  0x92   :  { %3000 = vst [vmem:[%s4478_s1 + $0xa0] sm:$0x1] %v2156_v26 }
  0x93   :  { %3002 = vst [vmem:[%s4478_s1 + $0xa2] sm:$0x1] %v2170_v28 }
  0x94   :  { %3004 = vst [vmem:[%s4478_s1 + $0xa4] sm:$0x1] %v2184_v30 }
  0x95   :  { %3006 = vst [vmem:[%s4478_s1 + $0xa6] sm:$0x1] %v2198_v31 }
  0x96   :  { %431 = vst.msk [vmem:[#allocation0 + $0x81] ss:$16 sm:$0x3] %vm243_vm0, %v3142_v32  }
  0x97   :  { %v2211_v33 = vld [vmem:[#allocation0 + $0x540] sm:$0x3]  ;;  %v2225_v34 = vld [vmem:[#allocation0 + $0x550] sm:$0x3] }
  0x98   :  { %v2212_v35 = vpack.c.bf16 0.0, %v2211_v33  ;;  %v2226_v36 = vpack.c.bf16 0.0, %v2225_v34  ;;  %v2239_v37 = vld [vmem:[#allocation0 + $0x560] sm:$0x3]  ;;  %v2253_v38 = vld [vmem:[#allocation0 + $0x570] sm:$0x3]  ;;  %v3182_v34 = vunpack.i.h.bf16 %v3580_v58 }
  0x99   :  { %v2240_v39 = vpack.c.bf16 0.0, %v2239_v37  ;;  %v2254_v40 = vpack.c.bf16 0.0, %v2253_v38  ;;  %433 = vst.msk [vmem:[#allocation0 + $0x81] ss:$16 sm:$0xc] %vm243_vm0, %v3142_v32  }
  0x9a   :  { %3008 = vst [vmem:[%s4478_s1 + $0xa8] sm:$0x1] %v2212_v35 }
  0x9b   :  { %3010 = vst [vmem:[%s4478_s1 + $0xaa] sm:$0x1] %v2226_v36 }
  0x9c   :  { %3012 = vst [vmem:[%s4478_s1 + $0xac] sm:$0x1] %v2240_v39  ;;  %v3661_v39 = vpop.permute.xlu1 %3154 }
  0x9d   :  { %3014 = vst [vmem:[%s4478_s1 + $0xae] sm:$0x1] %v2254_v40  ;;  %v1147_v41 = vld [vmem:[#allocation0 + $0x80] sm:$0x3]  ;;  %v1161_v42 = vld [vmem:[#allocation0 + $0x90] sm:$0x3] }
  0x9e   :  { %435 = vst.msk [vmem:[#allocation0 + $0x81] ss:$16 sm:$0x30] %vm243_vm0, %v3142_v32   ;;  %v1148_v43 = vpack.c.bf16 0.0, %v1147_v41  ;;  %v1162_v44 = vpack.c.bf16 0.0, %v1161_v42 }
  0x9f   :  { %437 = vst.msk [vmem:[#allocation0 + $0x81] ss:$16 sm:$0xc0] %vm243_vm0, %v3142_v32  }
  0xa0   :  { %2856 = vst [vmem:[%s4478_s1 + $0x10] sm:$0x1] %v1148_v43  ;;  %v1175_v46 = vld [vmem:[#allocation0 + $0xa0] sm:$0x3]  ;;  %v1189_v47 = vld [vmem:[#allocation0 + $0xb0] sm:$0x3] }
  0xa1   :  { %2858 = vst [vmem:[%s4478_s1 + $0x12] sm:$0x1] %v1162_v44  ;;  %v1176_v48 = vpack.c.bf16 0.0, %v1175_v46  ;;  %v1190_v49 = vpack.c.bf16 0.0, %v1189_v47 }
  0xa2   :  { %418 = vst.msk [vmem:[#allocation0 + $0x1] ss:$16 sm:$0x3] %vm243_vm0, %v3141_v45  }
  0xa3   :  { %2860 = vst [vmem:[%s4478_s1 + $0x14] sm:$0x1] %v1176_v48  ;;  %v3181_v48 = vunpack.i.l.bf16 %v3580_v58 }
  0xa4   :  { %2862 = vst [vmem:[%s4478_s1 + $0x16] sm:$0x1] %v1190_v49  ;;  %v3147_v49 = vunpack.i.h.bf16 %v3601_v4 }
  0xa5   :  { %v1203_v50 = vld [vmem:[#allocation0 + $0xc0] sm:$0x3]  ;;  %v1217_v51 = vld [vmem:[#allocation0 + $0xd0] sm:$0x3] }
  0xa6   :  { %v1204_v52 = vpack.c.bf16 0.0, %v1203_v50  ;;  %v1218_v53 = vpack.c.bf16 0.0, %v1217_v51  ;;  %v1231_v54 = vld [vmem:[#allocation0 + $0xe0] sm:$0x3]  ;;  %v1245_v55 = vld [vmem:[#allocation0 + $0xf0] sm:$0x3]  ;;  %v3146_v50 = vunpack.i.l.bf16 %v3601_v4 }
  0xa7   :  { %v1232_v56 = vpack.c.bf16 0.0, %v1231_v54  ;;  %v1246_v57 = vpack.c.bf16 0.0, %v1245_v55  ;;  %420 = vst.msk [vmem:[#allocation0 + $0x1] ss:$16 sm:$0xc] %vm243_vm0, %v3141_v45  }
  0xa8   :  { %2864 = vst [vmem:[%s4478_s1 + $0x18] sm:$0x1] %v1204_v52 }
  0xa9   :  { %2866 = vst [vmem:[%s4478_s1 + $0x1a] sm:$0x1] %v1218_v53  ;;  %v1036_v59 = vld [vmem:[#allocation0] sm:$0x3]  ;;  %v1049_v60 = vld [vmem:[#allocation0 + $0x10] sm:$0x3] }
  0xaa   :  { %2868 = vst [vmem:[%s4478_s1 + $0x1c] sm:$0x1] %v1232_v56  ;;  %v1037_v61 = vpack.c.bf16 0.0, %v1036_v59  ;;  %v1050_v62 = vpack.c.bf16 0.0, %v1049_v60 }
  0xab   :  { %2870 = vst [vmem:[%s4478_s1 + $0x1e] sm:$0x1] %v1246_v57 }
  0xac   :  { %422 = vst.msk [vmem:[#allocation0 + $0x1] ss:$16 sm:$0x30] %vm243_vm0, %v3141_v45  }
  0xad   :  { %424 = vst.msk [vmem:[#allocation0 + $0x1] ss:$16 sm:$0xc0] %vm243_vm0, %v3141_v45  }
  0xae   :  { %1040 = vst [vmem:[%s4478_s1] sm:$0x1] %v1037_v61  ;;  %v1063_v0 = vld [vmem:[#allocation0 + $0x20] sm:$0x3]  ;;  %v1077_v1 = vld [vmem:[#allocation0 + $0x30] sm:$0x3] }
  0xaf   :  { %2842 = vst [vmem:[%s4478_s1 + $0x2] sm:$0x1] %v1050_v62  ;;  %v1064_v2 = vpack.c.bf16 0.0, %v1063_v0  ;;  %v1078_v3 = vpack.c.bf16 0.0, %v1077_v1 }
  0xb0   :  { %483 = vst.msk [vmem:[#allocation0 + $0x281] ss:$16 sm:$0x3] %vm243_vm0, %v3152_v63  }
  0xb1   :  { %2844 = vst [vmem:[%s4478_s1 + $0x4] sm:$0x1] %v1064_v2 }
  0xb2   :  { %2846 = vst [vmem:[%s4478_s1 + $0x6] sm:$0x1] %v1078_v3  ;;  %v3707_v3 = vpop.permute.xlu2 %3194 }
  0xb3   :  { %v1091_v5 = vld [vmem:[#allocation0 + $0x40] sm:$0x3]  ;;  %v1105_v6 = vld [vmem:[#allocation0 + $0x50] sm:$0x3] }
  0xb4   :  { %v1092_v7 = vpack.c.bf16 0.0, %v1091_v5  ;;  %v1106_v8 = vpack.c.bf16 0.0, %v1105_v6  ;;  %v1119_v9 = vld [vmem:[#allocation0 + $0x60] sm:$0x3]  ;;  %v1133_v10 = vld [vmem:[#allocation0 + $0x70] sm:$0x3] }
  0xb5   :  { %v1120_v11 = vpack.c.bf16 0.0, %v1119_v9  ;;  %v1134_v12 = vpack.c.bf16 0.0, %v1133_v10  ;;  %485 = vst.msk [vmem:[#allocation0 + $0x281] ss:$16 sm:$0xc] %vm243_vm0, %v3152_v63  }
  0xb6   :  { %2848 = vst [vmem:[%s4478_s1 + $0x8] sm:$0x1] %v1092_v7 }
  0xb7   :  { %2850 = vst [vmem:[%s4478_s1 + $0xa] sm:$0x1] %v1106_v8  ;;  %v1595_v13 = vld [vmem:[#allocation0 + $0x280] sm:$0x3]  ;;  %v1609_v14 = vld [vmem:[#allocation0 + $0x290] sm:$0x3] }
  0xb8   :  { %2852 = vst [vmem:[%s4478_s1 + $0xc] sm:$0x1] %v1120_v11  ;;  %v1596_v15 = vpack.c.bf16 0.0, %v1595_v13  ;;  %v1610_v16 = vpack.c.bf16 0.0, %v1609_v14 }
  0xb9   :  { %2854 = vst [vmem:[%s4478_s1 + $0xe] sm:$0x1] %v1134_v12 }
  0xba   :  { %487 = vst.msk [vmem:[#allocation0 + $0x281] ss:$16 sm:$0x30] %vm243_vm0, %v3152_v63  }
  0xbb   :  { %489 = vst.msk [vmem:[#allocation0 + $0x281] ss:$16 sm:$0xc0] %vm243_vm0, %v3152_v63  }
  0xbc   :  { %2920 = vst [vmem:[%s4478_s1 + $0x50] sm:$0x1] %v1596_v15  ;;  %v1623_v18 = vld [vmem:[#allocation0 + $0x2a0] sm:$0x3]  ;;  %v1637_v19 = vld [vmem:[#allocation0 + $0x2b0] sm:$0x3] }
  0xbd   :  { %2922 = vst [vmem:[%s4478_s1 + $0x52] sm:$0x1] %v1610_v16  ;;  %v1624_v20 = vpack.c.bf16 0.0, %v1623_v18  ;;  %v1638_v21 = vpack.c.bf16 0.0, %v1637_v19  ;;  %v3731_v16 = vpop.permute.xlu2 %3209  ;;  %v3157_v18 = vunpack.i.h.bf16 %v3661_v39 }
  0xbe   :  { %470 = vst.msk [vmem:[#allocation0 + $0x201] ss:$16 sm:$0x3] %vm243_vm0, %v3151_v17  }
  0xbf   :  { %2924 = vst [vmem:[%s4478_s1 + $0x54] sm:$0x1] %v1624_v20 }
  0xc0   :  { %2926 = vst [vmem:[%s4478_s1 + $0x56] sm:$0x1] %v1638_v21 }
  0xc1   :  { %v1651_v22 = vld [vmem:[#allocation0 + $0x2c0] sm:$0x3]  ;;  %v1665_v23 = vld [vmem:[#allocation0 + $0x2d0] sm:$0x3] }
  0xc2   :  { %v1652_v24 = vpack.c.bf16 0.0, %v1651_v22  ;;  %v1666_v25 = vpack.c.bf16 0.0, %v1665_v23  ;;  %v1679_v26 = vld [vmem:[#allocation0 + $0x2e0] sm:$0x3]  ;;  %v1693_v27 = vld [vmem:[#allocation0 + $0x2f0] sm:$0x3]  ;;  %v3156_v23 = vunpack.i.l.bf16 %v3661_v39 }
  0xc3   :  { %v1680_v28 = vpack.c.bf16 0.0, %v1679_v26  ;;  %v1694_v29 = vpack.c.bf16 0.0, %v1693_v27  ;;  %472 = vst.msk [vmem:[#allocation0 + $0x201] ss:$16 sm:$0xc] %vm243_vm0, %v3151_v17  }
  0xc4   :  { %2928 = vst [vmem:[%s4478_s1 + $0x58] sm:$0x1] %v1652_v24 }
  0xc5   :  { %2930 = vst [vmem:[%s4478_s1 + $0x5a] sm:$0x1] %v1666_v25  ;;  %v1483_v30 = vld [vmem:[#allocation0 + $0x200] sm:$0x3]  ;;  %v1497_v31 = vld [vmem:[#allocation0 + $0x210] sm:$0x3] }
  0xc6   :  { %2932 = vst [vmem:[%s4478_s1 + $0x5c] sm:$0x1] %v1680_v28  ;;  %v1484_v32 = vpack.c.bf16 0.0, %v1483_v30  ;;  %v1498_v33 = vpack.c.bf16 0.0, %v1497_v31 }
  0xc7   :  { %2934 = vst [vmem:[%s4478_s1 + $0x5e] sm:$0x1] %v1694_v29 }
  0xc8   :  { %474 = vst.msk [vmem:[#allocation0 + $0x201] ss:$16 sm:$0x30] %vm243_vm0, %v3151_v17  }
  0xc9   :  { %476 = vst.msk [vmem:[#allocation0 + $0x201] ss:$16 sm:$0xc0] %vm243_vm0, %v3151_v17   ;;  %v3733_v17 = vpop.permute.xlu0 %3169 }
  0xca   :  { %2904 = vst [vmem:[%s4478_s1 + $0x40] sm:$0x1] %v1484_v32  ;;  %v1511_v35 = vld [vmem:[#allocation0 + $0x220] sm:$0x3]  ;;  %v1525_v36 = vld [vmem:[#allocation0 + $0x230] sm:$0x3] }
  0xcb   :  { %2906 = vst [vmem:[%s4478_s1 + $0x42] sm:$0x1] %v1498_v33  ;;  %v1512_v37 = vpack.c.bf16 0.0, %v1511_v35  ;;  %v1526_v38 = vpack.c.bf16 0.0, %v1525_v36 }
  0xcc   :  { %638 = vst.msk [vmem:[#allocation0 + $0x88] ss:$16 sm:$0x3] %vm243_vm0, %v3182_v34  }
  0xcd   :  { %2908 = vst [vmem:[%s4478_s1 + $0x44] sm:$0x1] %v1512_v37 }
  0xce   :  { %2910 = vst [vmem:[%s4478_s1 + $0x46] sm:$0x1] %v1526_v38 }
  0xcf   :  { %v1539_v40 = vld [vmem:[#allocation0 + $0x240] sm:$0x3]  ;;  %v1553_v41 = vld [vmem:[#allocation0 + $0x250] sm:$0x3] }
  0xd0   :  { %v1540_v42 = vpack.c.bf16 0.0, %v1539_v40  ;;  %v1554_v43 = vpack.c.bf16 0.0, %v1553_v41  ;;  %v1567_v44 = vld [vmem:[#allocation0 + $0x260] sm:$0x3]  ;;  %v1581_v45 = vld [vmem:[#allocation0 + $0x270] sm:$0x3] }
  0xd1   :  { %v1568_v46 = vpack.c.bf16 0.0, %v1567_v44  ;;  %v1582_v47 = vpack.c.bf16 0.0, %v1581_v45  ;;  %640 = vst.msk [vmem:[#allocation0 + $0x88] ss:$16 sm:$0xc] %vm243_vm0, %v3182_v34  }
  0xd2   :  { %2912 = vst [vmem:[%s4478_s1 + $0x48] sm:$0x1] %v1540_v42 }
  0xd3   :  { %2914 = vst [vmem:[%s4478_s1 + $0x4a] sm:$0x1] %v1554_v43 }
  0xd4   :  { %2916 = vst [vmem:[%s4478_s1 + $0x4c] sm:$0x1] %v1568_v46 }
  0xd5   :  { %2918 = vst [vmem:[%s4478_s1 + $0x4e] sm:$0x1] %v1582_v47 }
  0xd6   :  { %642 = vst.msk [vmem:[#allocation0 + $0x88] ss:$16 sm:$0x30] %vm243_vm0, %v3182_v34  }
  0xd7   :  { %644 = vst.msk [vmem:[#allocation0 + $0x88] ss:$16 sm:$0xc0] %vm243_vm0, %v3182_v34  }
  0xd8   :  { %625 = vst.msk [vmem:[#allocation0 + $0x8] ss:$16 sm:$0x3] %vm243_vm0, %v3181_v48  }
  0xd9   :  { %627 = vst.msk [vmem:[#allocation0 + $0x8] ss:$16 sm:$0xc] %vm243_vm0, %v3181_v48  }
  0xda   :  { %629 = vst.msk [vmem:[#allocation0 + $0x8] ss:$16 sm:$0x30] %vm243_vm0, %v3181_v48  }
  0xdb   :  { %631 = vst.msk [vmem:[#allocation0 + $0x8] ss:$16 sm:$0xc0] %vm243_vm0, %v3181_v48   ;;  %v3197_v48 = vunpack.i.h.bf16 %v3707_v3 }
  0xdc   :  { %457 = vst.msk [vmem:[#allocation0 + $0x181] ss:$16 sm:$0x3] %vm243_vm0, %v3147_v49  }
  0xdd   :  { %459 = vst.msk [vmem:[#allocation0 + $0x181] ss:$16 sm:$0xc] %vm243_vm0, %v3147_v49  }
  0xde   :  { %461 = vst.msk [vmem:[#allocation0 + $0x181] ss:$16 sm:$0x30] %vm243_vm0, %v3147_v49  }
  0xdf   :  { %463 = vst.msk [vmem:[#allocation0 + $0x181] ss:$16 sm:$0xc0] %vm243_vm0, %v3147_v49  }
  0xe0   :  { %444 = vst.msk [vmem:[#allocation0 + $0x101] ss:$16 sm:$0x3] %vm243_vm0, %v3146_v50  }
  0xe1   :  { %446 = vst.msk [vmem:[#allocation0 + $0x101] ss:$16 sm:$0xc] %vm243_vm0, %v3146_v50  }
  0xe2   :  { %448 = vst.msk [vmem:[#allocation0 + $0x101] ss:$16 sm:$0x30] %vm243_vm0, %v3146_v50  }
  0xe3   :  { %v1371_v51 = vld [vmem:[#allocation0 + $0x180] sm:$0x3]  ;;  %v1385_v52 = vld [vmem:[#allocation0 + $0x190] sm:$0x3] }
  0xe4   :  { %v1372_v53 = vpack.c.bf16 0.0, %v1371_v51  ;;  %v1386_v54 = vpack.c.bf16 0.0, %v1385_v52  ;;  %v1399_v55 = vld [vmem:[#allocation0 + $0x1a0] sm:$0x3]  ;;  %v1413_v56 = vld [vmem:[#allocation0 + $0x1b0] sm:$0x3] }
  0xe5   :  { %v1400_v57 = vpack.c.bf16 0.0, %v1399_v55  ;;  %v1414_v58 = vpack.c.bf16 0.0, %v1413_v56  ;;  %v1427_v59 = vld [vmem:[#allocation0 + $0x1c0] sm:$0x3]  ;;  %v1441_v60 = vld [vmem:[#allocation0 + $0x1d0] sm:$0x3] }
  0xe6   :  { %2888 = vst [vmem:[%s4478_s1 + $0x30] sm:$0x1] %v1372_v53  ;;  %v1428_v61 = vpack.c.bf16 0.0, %v1427_v59  ;;  %v1455_v62 = vld [vmem:[#allocation0 + $0x1e0] sm:$0x3]  ;;  %v1442_v63 = vpack.c.bf16 0.0, %v1441_v60  ;;  %v3212_v59 = vunpack.i.h.bf16 %v3731_v16  ;;  %v3211_v60 = vunpack.i.l.bf16 %v3731_v16 }
  0xe7   :  { %2890 = vst [vmem:[%s4478_s1 + $0x32] sm:$0x1] %v1386_v54  ;;  %v1469_v0 = vld [vmem:[#allocation0 + $0x1f0] sm:$0x3]  ;;  %v1456_v1 = vpack.c.bf16 0.0, %v1455_v62  ;;  %v3171_v62 = vunpack.i.l.bf16 %v3733_v17 }
  0xe8   :  { %2892 = vst [vmem:[%s4478_s1 + $0x34] sm:$0x1] %v1400_v57  ;;  %v1259_v2 = vld [vmem:[#allocation0 + $0x100] sm:$0x3]  ;;  %v1470_v4 = vpack.c.bf16 0.0, %v1469_v0  ;;  %v3196_v57 = vunpack.i.l.bf16 %v3707_v3 }
  0xe9   :  { %2894 = vst [vmem:[%s4478_s1 + $0x36] sm:$0x1] %v1414_v58  ;;  %v1273_v5 = vld [vmem:[#allocation0 + $0x110] sm:$0x3]  ;;  %v1287_v6 = vld [vmem:[#allocation0 + $0x120] sm:$0x3]  ;;  %v3812_v58 = vpop.permute.xlu1 %3174 }
  0xea   :  { %2896 = vst [vmem:[%s4478_s1 + $0x38] sm:$0x1] %v1428_v61  ;;  %v1260_v7 = vpack.c.bf16 0.0, %v1259_v2  ;;  %v1301_v8 = vld [vmem:[#allocation0 + $0x130] sm:$0x3]  ;;  %v1274_v9 = vpack.c.bf16 0.0, %v1273_v5  ;;  %v3172_v61 = vunpack.i.h.bf16 %v3733_v17 }
  0xeb   :  { %2898 = vst [vmem:[%s4478_s1 + $0x3a] sm:$0x1] %v1442_v63  ;;  %v1315_v10 = vld [vmem:[#allocation0 + $0x140] sm:$0x3]  ;;  %v1288_v11 = vpack.c.bf16 0.0, %v1287_v6  ;;  %v1302_v13 = vpack.c.bf16 0.0, %v1301_v8 }
  0xec   :  { %2900 = vst [vmem:[%s4478_s1 + $0x3c] sm:$0x1] %v1456_v1  ;;  %v1329_v12 = vld [vmem:[#allocation0 + $0x150] sm:$0x3]  ;;  %v1316_v14 = vpack.c.bf16 0.0, %v1315_v10 }
  0xed   :  { %2902 = vst [vmem:[%s4478_s1 + $0x3e] sm:$0x1] %v1470_v4  ;;  %v1330_v15 = vpack.c.bf16 0.0, %v1329_v12 }
  0xee   :  { %450 = vst.msk [vmem:[#allocation0 + $0x101] ss:$16 sm:$0xc0] %vm243_vm0, %v3146_v50  }
  0xef   :  { %2872 = vst [vmem:[%s4478_s1 + $0x20] sm:$0x1] %v1260_v7 }
  0xf0   :  { %2874 = vst [vmem:[%s4478_s1 + $0x22] sm:$0x1] %v1274_v9 }
  0xf1   :  { %2876 = vst [vmem:[%s4478_s1 + $0x24] sm:$0x1] %v1288_v11 }
  0xf2   :  { %2878 = vst [vmem:[%s4478_s1 + $0x26] sm:$0x1] %v1302_v13 }
  0xf3   :  { %2880 = vst [vmem:[%s4478_s1 + $0x28] sm:$0x1] %v1316_v14 }
  0xf4   :  { %2882 = vst [vmem:[%s4478_s1 + $0x2a] sm:$0x1] %v1330_v15 }
  0xf5   :  { %v1343_v19 = vld [vmem:[#allocation0 + $0x160] sm:$0x3]  ;;  %v1357_v20 = vld [vmem:[#allocation0 + $0x170] sm:$0x3] }
  0xf6   :  { %v1344_v21 = vpack.c.bf16 0.0, %v1343_v19  ;;  %v1358_v22 = vpack.c.bf16 0.0, %v1357_v20  ;;  %509 = vst.msk [vmem:[#allocation0 + $0x381] ss:$16 sm:$0x3] %vm243_vm0, %v3157_v18  }
  0xf7   :  { %511 = vst.msk [vmem:[#allocation0 + $0x381] ss:$16 sm:$0xc] %vm243_vm0, %v3157_v18  }
  0xf8   :  { %2884 = vst [vmem:[%s4478_s1 + $0x2c] sm:$0x1] %v1344_v21 }
  0xf9   :  { %2886 = vst [vmem:[%s4478_s1 + $0x2e] sm:$0x1] %v1358_v22 }
  0xfa   :  { %513 = vst.msk [vmem:[#allocation0 + $0x381] ss:$16 sm:$0x30] %vm243_vm0, %v3157_v18  }
  0xfb   :  { %515 = vst.msk [vmem:[#allocation0 + $0x381] ss:$16 sm:$0xc0] %vm243_vm0, %v3157_v18  }
  0xfc   :  { %496 = vst.msk [vmem:[#allocation0 + $0x301] ss:$16 sm:$0x3] %vm243_vm0, %v3156_v23  }
  0xfd   :  { %v1819_v24 = vld [vmem:[#allocation0 + $0x380] sm:$0x3]  ;;  %v1833_v25 = vld [vmem:[#allocation0 + $0x390] sm:$0x3] }
  0xfe   :  { %v1820_v26 = vpack.c.bf16 0.0, %v1819_v24  ;;  %v1834_v27 = vpack.c.bf16 0.0, %v1833_v25  ;;  %v1847_v28 = vld [vmem:[#allocation0 + $0x3a0] sm:$0x3]  ;;  %v1861_v29 = vld [vmem:[#allocation0 + $0x3b0] sm:$0x3] }
  0xff   :  { %v1848_v30 = vpack.c.bf16 0.0, %v1847_v28  ;;  %v1862_v31 = vpack.c.bf16 0.0, %v1861_v29  ;;  %498 = vst.msk [vmem:[#allocation0 + $0x301] ss:$16 sm:$0xc] %vm243_vm0, %v3156_v23   ;;  %v3177_v28 = vunpack.i.h.bf16 %v3812_v58 }
 0x100   :  { %2952 = vst [vmem:[%s4478_s1 + $0x70] sm:$0x1] %v1820_v26 }
 0x101   :  { %2954 = vst [vmem:[%s4478_s1 + $0x72] sm:$0x1] %v1834_v27  ;;  %v1875_v32 = vld [vmem:[#allocation0 + $0x3c0] sm:$0x3]  ;;  %v1889_v33 = vld [vmem:[#allocation0 + $0x3d0] sm:$0x3]  ;;  %v3873_v27 = vpop.permute.xlu2 %3224 }
 0x102   :  { %2956 = vst [vmem:[%s4478_s1 + $0x74] sm:$0x1] %v1848_v30  ;;  %v1876_v34 = vpack.c.bf16 0.0, %v1875_v32  ;;  %v1890_v35 = vpack.c.bf16 0.0, %v1889_v33  ;;  %v1903_v36 = vld [vmem:[#allocation0 + $0x3e0] sm:$0x3]  ;;  %v3176_v33 = vunpack.i.l.bf16 %v3812_v58 }
 0x103   :  { %2958 = vst [vmem:[%s4478_s1 + $0x76] sm:$0x1] %v1862_v31  ;;  %v1904_v37 = vpack.c.bf16 0.0, %v1903_v36  ;;  %v1917_v38 = vld [vmem:[#allocation0 + $0x3f0] sm:$0x3] }
 0x104   :  { %2960 = vst [vmem:[%s4478_s1 + $0x78] sm:$0x1] %v1876_v34  ;;  %v1918_v39 = vpack.c.bf16 0.0, %v1917_v38  ;;  %v1707_v40 = vld [vmem:[#allocation0 + $0x300] sm:$0x3]  ;;  %v3894_v34 = vpop.permute.xlu0 %3184 }
 0x105   :  { %2962 = vst [vmem:[%s4478_s1 + $0x7a] sm:$0x1] %v1890_v35  ;;  %v1721_v41 = vld [vmem:[#allocation0 + $0x310] sm:$0x3]  ;;  %v1708_v42 = vpack.c.bf16 0.0, %v1707_v40 }
 0x106   :  { %2964 = vst [vmem:[%s4478_s1 + $0x7c] sm:$0x1] %v1904_v37  ;;  %v1735_v43 = vld [vmem:[#allocation0 + $0x320] sm:$0x3]  ;;  %v1722_v44 = vpack.c.bf16 0.0, %v1721_v41 }
 0x107   :  { %2966 = vst [vmem:[%s4478_s1 + $0x7e] sm:$0x1] %v1918_v39  ;;  %v1749_v45 = vld [vmem:[#allocation0 + $0x330] sm:$0x3]  ;;  %v1736_v46 = vpack.c.bf16 0.0, %v1735_v43 }
 0x108   :  { %500 = vst.msk [vmem:[#allocation0 + $0x301] ss:$16 sm:$0x30] %vm243_vm0, %v3156_v23   ;;  %v1750_v47 = vpack.c.bf16 0.0, %v1749_v45  ;;  %v3909_v45 = vpop.permute.xlu1 %3189 }
 0x109   :  { %502 = vst.msk [vmem:[#allocation0 + $0x301] ss:$16 sm:$0xc0] %vm243_vm0, %v3156_v23  }
 0x10a   :  { %2936 = vst [vmem:[%s4478_s1 + $0x60] sm:$0x1] %v1708_v42 }
 0x10b   :  { %2938 = vst [vmem:[%s4478_s1 + $0x62] sm:$0x1] %v1722_v44 }
 0x10c   :  { %2940 = vst [vmem:[%s4478_s1 + $0x64] sm:$0x1] %v1736_v46 }
 0x10d   :  { %2942 = vst [vmem:[%s4478_s1 + $0x66] sm:$0x1] %v1750_v47 }
 0x10e   :  { %716 = vst.msk [vmem:[#allocation0 + $0x388] ss:$16 sm:$0x3] %vm243_vm0, %v3197_v48  }
 0x10f   :  { %v1763_v49 = vld [vmem:[#allocation0 + $0x340] sm:$0x3]  ;;  %v1777_v50 = vld [vmem:[#allocation0 + $0x350] sm:$0x3] }
 0x110   :  { %v1764_v51 = vpack.c.bf16 0.0, %v1763_v49  ;;  %v1778_v52 = vpack.c.bf16 0.0, %v1777_v50  ;;  %v1791_v53 = vld [vmem:[#allocation0 + $0x360] sm:$0x3]  ;;  %v1805_v54 = vld [vmem:[#allocation0 + $0x370] sm:$0x3] }
 0x111   :  { %v1792_v55 = vpack.c.bf16 0.0, %v1791_v53  ;;  %v1806_v56 = vpack.c.bf16 0.0, %v1805_v54  ;;  %718 = vst.msk [vmem:[#allocation0 + $0x388] ss:$16 sm:$0xc] %vm243_vm0, %v3197_v48  }
 0x112   :  { %2944 = vst [vmem:[%s4478_s1 + $0x68] sm:$0x1] %v1764_v51 }
 0x113   :  { %2946 = vst [vmem:[%s4478_s1 + $0x6a] sm:$0x1] %v1778_v52 }
 0x114   :  { %2948 = vst [vmem:[%s4478_s1 + $0x6c] sm:$0x1] %v1792_v55 }
 0x115   :  { %2950 = vst [vmem:[%s4478_s1 + $0x6e] sm:$0x1] %v1806_v56 }
 0x116   :  { %720 = vst.msk [vmem:[#allocation0 + $0x388] ss:$16 sm:$0x30] %vm243_vm0, %v3197_v48  }
 0x117   :  { %722 = vst.msk [vmem:[#allocation0 + $0x388] ss:$16 sm:$0xc0] %vm243_vm0, %v3197_v48  }
 0x118   :  { %703 = vst.msk [vmem:[#allocation0 + $0x308] ss:$16 sm:$0x3] %vm243_vm0, %v3196_v57  }
 0x119   :  { %705 = vst.msk [vmem:[#allocation0 + $0x308] ss:$16 sm:$0xc] %vm243_vm0, %v3196_v57  }
 0x11a   :  { %707 = vst.msk [vmem:[#allocation0 + $0x308] ss:$16 sm:$0x30] %vm243_vm0, %v3196_v57  }
 0x11b   :  { %709 = vst.msk [vmem:[#allocation0 + $0x308] ss:$16 sm:$0xc0] %vm243_vm0, %v3196_v57  }
 0x11c   :  { %794 = vst.msk [vmem:[#allocation0 + $0x688] ss:$16 sm:$0x3] %vm243_vm0, %v3212_v59  }
 0x11d   :  { %796 = vst.msk [vmem:[#allocation0 + $0x688] ss:$16 sm:$0xc] %vm243_vm0, %v3212_v59  }
 0x11e   :  { %798 = vst.msk [vmem:[#allocation0 + $0x688] ss:$16 sm:$0x30] %vm243_vm0, %v3212_v59  }
 0x11f   :  { %800 = vst.msk [vmem:[#allocation0 + $0x688] ss:$16 sm:$0xc0] %vm243_vm0, %v3212_v59  }
 0x120   :  { %781 = vst.msk [vmem:[#allocation0 + $0x608] ss:$16 sm:$0x3] %vm243_vm0, %v3211_v60  }
 0x121   :  { %783 = vst.msk [vmem:[#allocation0 + $0x608] ss:$16 sm:$0xc] %vm243_vm0, %v3211_v60  }
 0x122   :  { %785 = vst.msk [vmem:[#allocation0 + $0x608] ss:$16 sm:$0x30] %vm243_vm0, %v3211_v60  }
 0x123   :  { %787 = vst.msk [vmem:[#allocation0 + $0x608] ss:$16 sm:$0xc0] %vm243_vm0, %v3211_v60   ;;  %v3227_v60 = vunpack.i.h.bf16 %v3873_v27 }
 0x124   :  { %587 = vst.msk [vmem:[#allocation0 + $0x681] ss:$16 sm:$0x3] %vm243_vm0, %v3172_v61  }
 0x125   :  { %589 = vst.msk [vmem:[#allocation0 + $0x681] ss:$16 sm:$0xc] %vm243_vm0, %v3172_v61  }
 0x126   :  { %591 = vst.msk [vmem:[#allocation0 + $0x681] ss:$16 sm:$0x30] %vm243_vm0, %v3172_v61  }
 0x127   :  { %593 = vst.msk [vmem:[#allocation0 + $0x681] ss:$16 sm:$0xc0] %vm243_vm0, %v3172_v61  }
 0x128   :  { %574 = vst.msk [vmem:[#allocation0 + $0x601] ss:$16 sm:$0x3] %vm243_vm0, %v3171_v62  }
 0x129   :  { %576 = vst.msk [vmem:[#allocation0 + $0x601] ss:$16 sm:$0xc] %vm243_vm0, %v3171_v62  }
 0x12a   :  { %578 = vst.msk [vmem:[#allocation0 + $0x601] ss:$16 sm:$0x30] %vm243_vm0, %v3171_v62  }
 0x12b   :  { %v2491_v63 = vld [vmem:[#allocation0 + $0x680] sm:$0x3]  ;;  %v2505_v0 = vld [vmem:[#allocation0 + $0x690] sm:$0x3] }
 0x12c   :  { %v2492_v1 = vpack.c.bf16 0.0, %v2491_v63  ;;  %v2506_v2 = vpack.c.bf16 0.0, %v2505_v0  ;;  %v2519_v3 = vld [vmem:[#allocation0 + $0x6a0] sm:$0x3]  ;;  %v2533_v4 = vld [vmem:[#allocation0 + $0x6b0] sm:$0x3] }
 0x12d   :  { %v2520_v5 = vpack.c.bf16 0.0, %v2519_v3  ;;  %v2534_v6 = vpack.c.bf16 0.0, %v2533_v4  ;;  %v2547_v7 = vld [vmem:[#allocation0 + $0x6c0] sm:$0x3]  ;;  %v2561_v8 = vld [vmem:[#allocation0 + $0x6d0] sm:$0x3] }
 0x12e   :  { %3048 = vst [vmem:[%s4478_s1 + $0xd0] sm:$0x1] %v2492_v1  ;;  %v2548_v9 = vpack.c.bf16 0.0, %v2547_v7  ;;  %v2575_v10 = vld [vmem:[#allocation0 + $0x6e0] sm:$0x3]  ;;  %v2562_v11 = vpack.c.bf16 0.0, %v2561_v8  ;;  %v3187_v7 = vunpack.i.h.bf16 %v3894_v34  ;;  %v3186_v8 = vunpack.i.l.bf16 %v3894_v34 }
 0x12f   :  { %3050 = vst [vmem:[%s4478_s1 + $0xd2] sm:$0x1] %v2506_v2  ;;  %v2589_v12 = vld [vmem:[#allocation0 + $0x6f0] sm:$0x3]  ;;  %v2576_v13 = vpack.c.bf16 0.0, %v2575_v10 }
 0x130   :  { %3052 = vst [vmem:[%s4478_s1 + $0xd4] sm:$0x1] %v2520_v5  ;;  %v2379_v14 = vld [vmem:[#allocation0 + $0x600] sm:$0x3]  ;;  %v2590_v15 = vpack.c.bf16 0.0, %v2589_v12  ;;  %v3226_v5 = vunpack.i.l.bf16 %v3873_v27 }
 0x131   :  { %3054 = vst [vmem:[%s4478_s1 + $0xd6] sm:$0x1] %v2534_v6  ;;  %v2393_v16 = vld [vmem:[#allocation0 + $0x610] sm:$0x3]  ;;  %v2407_v17 = vld [vmem:[#allocation0 + $0x620] sm:$0x3]  ;;  %v3240_v6 = vpop.permute.xlu2 %3239 }
 0x132   :  { %3056 = vst [vmem:[%s4478_s1 + $0xd8] sm:$0x1] %v2548_v9  ;;  %v2380_v18 = vpack.c.bf16 0.0, %v2379_v14  ;;  %v2421_v19 = vld [vmem:[#allocation0 + $0x630] sm:$0x3]  ;;  %v2394_v20 = vpack.c.bf16 0.0, %v2393_v16  ;;  %v3975_v9 = vpop.permute.xlu0 %3199  ;;  %v3192_v14 = vunpack.i.h.bf16 %v3909_v45 }
 0x133   :  { %3058 = vst [vmem:[%s4478_s1 + $0xda] sm:$0x1] %v2562_v11  ;;  %v2435_v21 = vld [vmem:[#allocation0 + $0x640] sm:$0x3]  ;;  %v2408_v22 = vpack.c.bf16 0.0, %v2407_v17  ;;  %v2422_v24 = vpack.c.bf16 0.0, %v2421_v19  ;;  %v3191_v19 = vunpack.i.l.bf16 %v3909_v45 }
 0x134   :  { %3060 = vst [vmem:[%s4478_s1 + $0xdc] sm:$0x1] %v2576_v13  ;;  %v2449_v23 = vld [vmem:[#allocation0 + $0x650] sm:$0x3]  ;;  %v2436_v25 = vpack.c.bf16 0.0, %v2435_v21  ;;  %v3242_v21 = vunpack.i.h.bf16 %v3240_v6 }
 0x135   :  { %3062 = vst [vmem:[%s4478_s1 + $0xde] sm:$0x1] %v2590_v15  ;;  %v2450_v26 = vpack.c.bf16 0.0, %v2449_v23 }
 0x136   :  { %580 = vst.msk [vmem:[#allocation0 + $0x601] ss:$16 sm:$0xc0] %vm243_vm0, %v3171_v62  }
 0x137   :  { %3032 = vst [vmem:[%s4478_s1 + $0xc0] sm:$0x1] %v2380_v18 }
 0x138   :  { %3034 = vst [vmem:[%s4478_s1 + $0xc2] sm:$0x1] %v2394_v20  ;;  %v3993_v20 = vpop.permute.xlu1 %3204 }
 0x139   :  { %3036 = vst [vmem:[%s4478_s1 + $0xc4] sm:$0x1] %v2408_v22  ;;  %v3241_v22 = vunpack.i.l.bf16 %v3240_v6 }
 0x13a   :  { %3038 = vst [vmem:[%s4478_s1 + $0xc6] sm:$0x1] %v2422_v24 }
 0x13b   :  { %3040 = vst [vmem:[%s4478_s1 + $0xc8] sm:$0x1] %v2436_v25 }
 0x13c   :  { %3042 = vst [vmem:[%s4478_s1 + $0xca] sm:$0x1] %v2450_v26 }
 0x13d   :  { %v2463_v29 = vld [vmem:[#allocation0 + $0x660] sm:$0x3]  ;;  %v2477_v30 = vld [vmem:[#allocation0 + $0x670] sm:$0x3] }
 0x13e   :  { %v2464_v31 = vpack.c.bf16 0.0, %v2463_v29  ;;  %v2478_v32 = vpack.c.bf16 0.0, %v2477_v30  ;;  %613 = vst.msk [vmem:[#allocation0 + $0x781] ss:$16 sm:$0x3] %vm243_vm0, %v3177_v28  }
 0x13f   :  { %615 = vst.msk [vmem:[#allocation0 + $0x781] ss:$16 sm:$0xc] %vm243_vm0, %v3177_v28  }
 0x140   :  { %3044 = vst [vmem:[%s4478_s1 + $0xcc] sm:$0x1] %v2464_v31 }
 0x141   :  { %3046 = vst [vmem:[%s4478_s1 + $0xce] sm:$0x1] %v2478_v32 }
 0x142   :  { %617 = vst.msk [vmem:[#allocation0 + $0x781] ss:$16 sm:$0x30] %vm243_vm0, %v3177_v28  }
 0x143   :  { %619 = vst.msk [vmem:[#allocation0 + $0x781] ss:$16 sm:$0xc0] %vm243_vm0, %v3177_v28  }
 0x144   :  { %600 = vst.msk [vmem:[#allocation0 + $0x701] ss:$16 sm:$0x3] %vm243_vm0, %v3176_v33  }
 0x145   :  { %v2715_v35 = vld [vmem:[#allocation0 + $0x780] sm:$0x3]  ;;  %v2729_v36 = vld [vmem:[#allocation0 + $0x790] sm:$0x3] }
 0x146   :  { %v2716_v37 = vpack.c.bf16 0.0, %v2715_v35  ;;  %v2730_v38 = vpack.c.bf16 0.0, %v2729_v36  ;;  %v2743_v39 = vld [vmem:[#allocation0 + $0x7a0] sm:$0x3]  ;;  %v2757_v40 = vld [vmem:[#allocation0 + $0x7b0] sm:$0x3] }
 0x147   :  { %v2744_v41 = vpack.c.bf16 0.0, %v2743_v39  ;;  %v2758_v42 = vpack.c.bf16 0.0, %v2757_v40  ;;  %602 = vst.msk [vmem:[#allocation0 + $0x701] ss:$16 sm:$0xc] %vm243_vm0, %v3176_v33  }
 0x148   :  { %3080 = vst [vmem:[%s4478_s1 + $0xf0] sm:$0x1] %v2716_v37 }
 0x149   :  { %3082 = vst [vmem:[%s4478_s1 + $0xf2] sm:$0x1] %v2730_v38  ;;  %v2771_v43 = vld [vmem:[#allocation0 + $0x7c0] sm:$0x3]  ;;  %v2785_v44 = vld [vmem:[#allocation0 + $0x7d0] sm:$0x3] }
 0x14a   :  { %3084 = vst [vmem:[%s4478_s1 + $0xf4] sm:$0x1] %v2744_v41  ;;  %v2772_v46 = vpack.c.bf16 0.0, %v2771_v43  ;;  %v2786_v47 = vpack.c.bf16 0.0, %v2785_v44  ;;  %v2799_v48 = vld [vmem:[#allocation0 + $0x7e0] sm:$0x3]  ;;  %v3255_v44 = vpop.permute.xlu2 %3254 }
 0x14b   :  { %3086 = vst [vmem:[%s4478_s1 + $0xf6] sm:$0x1] %v2758_v42  ;;  %v2800_v49 = vpack.c.bf16 0.0, %v2799_v48  ;;  %v2813_v50 = vld [vmem:[#allocation0 + $0x7f0] sm:$0x3]  ;;  %v3202_v48 = vunpack.i.h.bf16 %v3975_v9 }
 0x14c   :  { %3088 = vst [vmem:[%s4478_s1 + $0xf8] sm:$0x1] %v2772_v46  ;;  %v2814_v51 = vpack.c.bf16 0.0, %v2813_v50  ;;  %v2603_v52 = vld [vmem:[#allocation0 + $0x700] sm:$0x3]  ;;  %v4055_v50 = vpop.permute.xlu0 %3214 }
 0x14d   :  { %3090 = vst [vmem:[%s4478_s1 + $0xfa] sm:$0x1] %v2786_v47  ;;  %v2617_v53 = vld [vmem:[#allocation0 + $0x710] sm:$0x3]  ;;  %v2604_v54 = vpack.c.bf16 0.0, %v2603_v52 }
 0x14e   :  { %3092 = vst [vmem:[%s4478_s1 + $0xfc] sm:$0x1] %v2800_v49  ;;  %v2631_v55 = vld [vmem:[#allocation0 + $0x720] sm:$0x3]  ;;  %v2618_v56 = vpack.c.bf16 0.0, %v2617_v53  ;;  %v3201_v49 = vunpack.i.l.bf16 %v3975_v9 }
 0x14f   :  { %3094 = vst [vmem:[%s4478_s1 + $0xfe] sm:$0x1] %v2814_v51  ;;  %v2645_v57 = vld [vmem:[#allocation0 + $0x730] sm:$0x3]  ;;  %v2632_v58 = vpack.c.bf16 0.0, %v2631_v55  ;;  %v3207_v55 = vunpack.i.h.bf16 %v3993_v20 }
 0x150   :  { %604 = vst.msk [vmem:[#allocation0 + $0x701] ss:$16 sm:$0x30] %vm243_vm0, %v3176_v33   ;;  %v2646_v59 = vpack.c.bf16 0.0, %v2645_v57 }
 0x151   :  { %606 = vst.msk [vmem:[#allocation0 + $0x701] ss:$16 sm:$0xc0] %vm243_vm0, %v3176_v33  }
 0x152   :  { %3064 = vst [vmem:[%s4478_s1 + $0xe0] sm:$0x1] %v2604_v54 }
 0x153   :  { %3066 = vst [vmem:[%s4478_s1 + $0xe2] sm:$0x1] %v2618_v56 }
 0x154   :  { %3068 = vst [vmem:[%s4478_s1 + $0xe4] sm:$0x1] %v2632_v58 }
 0x155   :  { %3070 = vst [vmem:[%s4478_s1 + $0xe6] sm:$0x1] %v2646_v59 }
 0x156   :  { %871 = vst.msk [vmem:[#allocation0 + $0x189] ss:$16 sm:$0x3] %vm243_vm0, %v3227_v60  }
 0x157   :  { %v2659_v61 = vld [vmem:[#allocation0 + $0x740] sm:$0x3]  ;;  %v2673_v62 = vld [vmem:[#allocation0 + $0x750] sm:$0x3] }
 0x158   :  { %v2660_v63 = vpack.c.bf16 0.0, %v2659_v61  ;;  %v2674_v0 = vpack.c.bf16 0.0, %v2673_v62  ;;  %v2687_v1 = vld [vmem:[#allocation0 + $0x760] sm:$0x3]  ;;  %v2701_v2 = vld [vmem:[#allocation0 + $0x770] sm:$0x3]  ;;  %v4070_v61 = vpop.permute.xlu1 %3219  ;;  %v3257_v62 = vunpack.i.h.bf16 %v3255_v44 }
 0x159   :  { %v2688_v3 = vpack.c.bf16 0.0, %v2687_v1  ;;  %v2702_v4 = vpack.c.bf16 0.0, %v2701_v2  ;;  %873 = vst.msk [vmem:[#allocation0 + $0x189] ss:$16 sm:$0xc] %vm243_vm0, %v3227_v60  }
 0x15a   :  { %3072 = vst [vmem:[%s4478_s1 + $0xe8] sm:$0x1] %v2660_v63  ;;  %v3256_v63 = vunpack.i.l.bf16 %v3255_v44 }
 0x15b   :  { %3074 = vst [vmem:[%s4478_s1 + $0xea] sm:$0x1] %v2674_v0 }
 0x15c   :  { %3076 = vst [vmem:[%s4478_s1 + $0xec] sm:$0x1] %v2688_v3 }
 0x15d   :  { %3078 = vst [vmem:[%s4478_s1 + $0xee] sm:$0x1] %v2702_v4 }
 0x15e   :  { %875 = vst.msk [vmem:[#allocation0 + $0x189] ss:$16 sm:$0x30] %vm243_vm0, %v3227_v60  }
 0x15f   :  { %877 = vst.msk [vmem:[#allocation0 + $0x189] ss:$16 sm:$0xc0] %vm243_vm0, %v3227_v60   ;;  %v3206_v60 = vunpack.i.l.bf16 %v3993_v20 }
 0x160   :  { %858 = vst.msk [vmem:[#allocation0 + $0x109] ss:$16 sm:$0x3] %vm243_vm0, %v3226_v5  }
 0x161   :  { %860 = vst.msk [vmem:[#allocation0 + $0x109] ss:$16 sm:$0xc] %vm243_vm0, %v3226_v5  }
 0x162   :  { %862 = vst.msk [vmem:[#allocation0 + $0x109] ss:$16 sm:$0x30] %vm243_vm0, %v3226_v5  }
 0x163   :  { %864 = vst.msk [vmem:[#allocation0 + $0x109] ss:$16 sm:$0xc0] %vm243_vm0, %v3226_v5  }
 0x164   :  { %664 = vst.msk [vmem:[#allocation0 + $0x188] ss:$16 sm:$0x3] %vm243_vm0, %v3187_v7  }
 0x165   :  { %666 = vst.msk [vmem:[#allocation0 + $0x188] ss:$16 sm:$0xc] %vm243_vm0, %v3187_v7  }
 0x166   :  { %668 = vst.msk [vmem:[#allocation0 + $0x188] ss:$16 sm:$0x30] %vm243_vm0, %v3187_v7  }
 0x167   :  { %670 = vst.msk [vmem:[#allocation0 + $0x188] ss:$16 sm:$0xc0] %vm243_vm0, %v3187_v7  }
 0x168   :  { %651 = vst.msk [vmem:[#allocation0 + $0x108] ss:$16 sm:$0x3] %vm243_vm0, %v3186_v8  }
 0x169   :  { %653 = vst.msk [vmem:[#allocation0 + $0x108] ss:$16 sm:$0xc] %vm243_vm0, %v3186_v8  }
 0x16a   :  { %655 = vst.msk [vmem:[#allocation0 + $0x108] ss:$16 sm:$0x30] %vm243_vm0, %v3186_v8  }
 0x16b   :  { %657 = vst.msk [vmem:[#allocation0 + $0x108] ss:$16 sm:$0xc0] %vm243_vm0, %v3186_v8   ;;  %v1378_v32 = vld [vmem:[#allocation0 + $0x188] sm:$0x3] }
 0x16c   :  { %690 = vst.msk [vmem:[#allocation0 + $0x288] ss:$16 sm:$0x3] %vm243_vm0, %v3192_v14   ;;  %v1392_v34 = vld [vmem:[#allocation0 + $0x198] sm:$0x3]  ;;  %v1379_v39 = vpack.c.bf16 0.0, %v1378_v32 }
 0x16d   :  { %692 = vst.msk [vmem:[#allocation0 + $0x288] ss:$16 sm:$0xc] %vm243_vm0, %v3192_v14   ;;  %v1406_v36 = vld [vmem:[#allocation0 + $0x1a8] sm:$0x3]  ;;  %v1393_v41 = vpack.c.bf16 0.0, %v1392_v34 }
 0x16e   :  { %v1462_v10 = vld [vmem:[#allocation0 + $0x1e8] sm:$0x3]  ;;  %v1476_v11 = vld [vmem:[#allocation0 + $0x1f8] sm:$0x3]  ;;  %v1407_v43 = vpack.c.bf16 0.0, %v1406_v36 }
 0x16f   :  { %v1463_v12 = vpack.c.bf16 0.0, %v1462_v10  ;;  %v1477_v13 = vpack.c.bf16 0.0, %v1476_v11  ;;  %694 = vst.msk [vmem:[#allocation0 + $0x288] ss:$16 sm:$0x30] %vm243_vm0, %v3192_v14  }
 0x170   :  { %696 = vst.msk [vmem:[#allocation0 + $0x288] ss:$16 sm:$0xc0] %vm243_vm0, %v3192_v14   ;;  %v1266_v23 = vld [vmem:[#allocation0 + $0x108] sm:$0x3] }
 0x171   :  { %2901 = vst [vmem:[%s4478_s1 + $0x3d] sm:$0x1] %v1463_v12  ;;  %v1280_v24 = vld [vmem:[#allocation0 + $0x118] sm:$0x3]  ;;  %v1294_v25 = vld [vmem:[#allocation0 + $0x128] sm:$0x3] }
 0x172   :  { %2903 = vst [vmem:[%s4478_s1 + $0x3f] sm:$0x1] %v1477_v13  ;;  %v1350_v15 = vld [vmem:[#allocation0 + $0x168] sm:$0x3]  ;;  %v1364_v16 = vld [vmem:[#allocation0 + $0x178] sm:$0x3] }
 0x173   :  { %v1351_v17 = vpack.c.bf16 0.0, %v1350_v15  ;;  %v1365_v18 = vpack.c.bf16 0.0, %v1364_v16  ;;  %677 = vst.msk [vmem:[#allocation0 + $0x208] ss:$16 sm:$0x3] %vm243_vm0, %v3191_v19   ;;  %v1267_v27 = vpack.c.bf16 0.0, %v1266_v23 }
 0x174   :  { %679 = vst.msk [vmem:[#allocation0 + $0x208] ss:$16 sm:$0xc] %vm243_vm0, %v3191_v19   ;;  %v1308_v26 = vld [vmem:[#allocation0 + $0x138] sm:$0x3]  ;;  %v1281_v29 = vpack.c.bf16 0.0, %v1280_v24  ;;  %v3217_v24 = vunpack.i.h.bf16 %v4055_v50 }
 0x175   :  { %2885 = vst [vmem:[%s4478_s1 + $0x2d] sm:$0x1] %v1351_v17  ;;  %v1322_v28 = vld [vmem:[#allocation0 + $0x148] sm:$0x3]  ;;  %v1336_v30 = vld [vmem:[#allocation0 + $0x158] sm:$0x3] }
 0x176   :  { %2887 = vst [vmem:[%s4478_s1 + $0x2f] sm:$0x1] %v1365_v18  ;;  %v1295_v31 = vpack.c.bf16 0.0, %v1294_v25  ;;  %v1309_v33 = vpack.c.bf16 0.0, %v1308_v26  ;;  %v1323_v35 = vpack.c.bf16 0.0, %v1322_v28  ;;  %v1337_v37 = vpack.c.bf16 0.0, %v1336_v30  ;;  %v3230_v26 = vpop.permute.xlu0 %3229 }
 0x177   :  { %681 = vst.msk [vmem:[#allocation0 + $0x208] ss:$16 sm:$0x30] %vm243_vm0, %v3191_v19   ;;  %v1420_v38 = vld [vmem:[#allocation0 + $0x1b8] sm:$0x3]  ;;  %v3216_v25 = vunpack.i.l.bf16 %v4055_v50  ;;  %v3231_v50 = vunpack.i.l.bf16 %v3230_v26 }
 0x178   :  { %683 = vst.msk [vmem:[#allocation0 + $0x208] ss:$16 sm:$0xc0] %vm243_vm0, %v3191_v19   ;;  %v1434_v40 = vld [vmem:[#allocation0 + $0x1c8] sm:$0x3]  ;;  %v1421_v45 = vpack.c.bf16 0.0, %v1420_v38 }
 0x179   :  { %949 = vst.msk [vmem:[#allocation0 + $0x489] ss:$16 sm:$0x3] %vm243_vm0, %v3242_v21   ;;  %v1448_v42 = vld [vmem:[#allocation0 + $0x1d8] sm:$0x3]  ;;  %v1435_v46 = vpack.c.bf16 0.0, %v1434_v40 }
 0x17a   :  { %951 = vst.msk [vmem:[#allocation0 + $0x489] ss:$16 sm:$0xc] %vm243_vm0, %v3242_v21   ;;  %v1449_v47 = vpack.c.bf16 0.0, %v1448_v42 }
 0x17b   :  { %953 = vst.msk [vmem:[#allocation0 + $0x489] ss:$16 sm:$0x30] %vm243_vm0, %v3242_v21  }
 0x17c   :  { %955 = vst.msk [vmem:[#allocation0 + $0x489] ss:$16 sm:$0xc0] %vm243_vm0, %v3242_v21  }
 0x17d   :  { %936 = vst.msk [vmem:[#allocation0 + $0x409] ss:$16 sm:$0x3] %vm243_vm0, %v3241_v22  }
 0x17e   :  { %938 = vst.msk [vmem:[#allocation0 + $0x409] ss:$16 sm:$0xc] %vm243_vm0, %v3241_v22  }
 0x17f   :  { %940 = vst.msk [vmem:[#allocation0 + $0x409] ss:$16 sm:$0x30] %vm243_vm0, %v3241_v22  }
 0x180   :  { %942 = vst.msk [vmem:[#allocation0 + $0x409] ss:$16 sm:$0xc0] %vm243_vm0, %v3241_v22  }
 0x181   :  { %2873 = vst [vmem:[%s4478_s1 + $0x21] sm:$0x1] %v1267_v27  ;;  %v3222_v27 = vunpack.i.h.bf16 %v4070_v61 }
 0x182   :  { %2875 = vst [vmem:[%s4478_s1 + $0x23] sm:$0x1] %v1281_v29  ;;  %v3221_v29 = vunpack.i.l.bf16 %v4070_v61 }
 0x183   :  { %2877 = vst [vmem:[%s4478_s1 + $0x25] sm:$0x1] %v1295_v31 }
 0x184   :  { %2879 = vst [vmem:[%s4478_s1 + $0x27] sm:$0x1] %v1309_v33 }
 0x185   :  { %2881 = vst [vmem:[%s4478_s1 + $0x29] sm:$0x1] %v1323_v35 }
 0x186   :  { %2883 = vst [vmem:[%s4478_s1 + $0x2b] sm:$0x1] %v1337_v37 }
 0x187   :  { %2889 = vst [vmem:[%s4478_s1 + $0x31] sm:$0x1] %v1379_v39 }
 0x188   :  { %2891 = vst [vmem:[%s4478_s1 + $0x33] sm:$0x1] %v1393_v41 }
 0x189   :  { %2893 = vst [vmem:[%s4478_s1 + $0x35] sm:$0x1] %v1407_v43 }
 0x18a   :  { %2895 = vst [vmem:[%s4478_s1 + $0x37] sm:$0x1] %v1421_v45 }
 0x18b   :  { %2897 = vst [vmem:[%s4478_s1 + $0x39] sm:$0x1] %v1435_v46  ;;  %v4156_v46 = vpop.permute.xlu1 %3234 }
 0x18c   :  { %2899 = vst [vmem:[%s4478_s1 + $0x3b] sm:$0x1] %v1449_v47 }
 0x18d   :  { %742 = vst.msk [vmem:[#allocation0 + $0x488] ss:$16 sm:$0x3] %vm243_vm0, %v3202_v48  }
 0x18e   :  { %744 = vst.msk [vmem:[#allocation0 + $0x488] ss:$16 sm:$0xc] %vm243_vm0, %v3202_v48  }
 0x18f   :  { %746 = vst.msk [vmem:[#allocation0 + $0x488] ss:$16 sm:$0x30] %vm243_vm0, %v3202_v48  }
 0x190   :  { %748 = vst.msk [vmem:[#allocation0 + $0x488] ss:$16 sm:$0xc0] %vm243_vm0, %v3202_v48   ;;  %v3232_v48 = vunpack.i.h.bf16 %v3230_v26  ;;  %v3236_v26 = vunpack.i.l.bf16 %v4156_v46 }
 0x191   :  { %729 = vst.msk [vmem:[#allocation0 + $0x408] ss:$16 sm:$0x3] %vm243_vm0, %v3201_v49  }
 0x192   :  { %731 = vst.msk [vmem:[#allocation0 + $0x408] ss:$16 sm:$0xc] %vm243_vm0, %v3201_v49  }
 0x193   :  { %733 = vst.msk [vmem:[#allocation0 + $0x408] ss:$16 sm:$0x30] %vm243_vm0, %v3201_v49  }
 0x194   :  { %735 = vst.msk [vmem:[#allocation0 + $0x408] ss:$16 sm:$0xc0] %vm243_vm0, %v3201_v49   ;;  %v2050_v9 = vld [vmem:[#allocation0 + $0x488] sm:$0x3] }
 0x195   :  { %768 = vst.msk [vmem:[#allocation0 + $0x588] ss:$16 sm:$0x3] %vm243_vm0, %v3207_v55   ;;  %v2064_v11 = vld [vmem:[#allocation0 + $0x498] sm:$0x3]  ;;  %v2051_v16 = vpack.c.bf16 0.0, %v2050_v9 }
 0x196   :  { %770 = vst.msk [vmem:[#allocation0 + $0x588] ss:$16 sm:$0xc] %vm243_vm0, %v3207_v55   ;;  %v2078_v13 = vld [vmem:[#allocation0 + $0x4a8] sm:$0x3]  ;;  %v2065_v18 = vpack.c.bf16 0.0, %v2064_v11  ;;  %v4203_v11 = vpop.permute.xlu0 %3244 }
 0x197   :  { %v2134_v51 = vld [vmem:[#allocation0 + $0x4e8] sm:$0x3]  ;;  %v2148_v52 = vld [vmem:[#allocation0 + $0x4f8] sm:$0x3]  ;;  %v2079_v20 = vpack.c.bf16 0.0, %v2078_v13 }
 0x198   :  { %v2135_v53 = vpack.c.bf16 0.0, %v2134_v51  ;;  %v2149_v54 = vpack.c.bf16 0.0, %v2148_v52  ;;  %772 = vst.msk [vmem:[#allocation0 + $0x588] ss:$16 sm:$0x30] %vm243_vm0, %v3207_v55  }
 0x199   :  { %774 = vst.msk [vmem:[#allocation0 + $0x588] ss:$16 sm:$0xc0] %vm243_vm0, %v3207_v55   ;;  %v1938_v0 = vld [vmem:[#allocation0 + $0x408] sm:$0x3] }
 0x19a   :  { %2997 = vst [vmem:[%s4478_s1 + $0x9d] sm:$0x1] %v2135_v53  ;;  %v1952_v1 = vld [vmem:[#allocation0 + $0x418] sm:$0x3]  ;;  %v1966_v2 = vld [vmem:[#allocation0 + $0x428] sm:$0x3] }
 0x19b   :  { %2999 = vst [vmem:[%s4478_s1 + $0x9f] sm:$0x1] %v2149_v54  ;;  %v2022_v56 = vld [vmem:[#allocation0 + $0x468] sm:$0x3]  ;;  %v2036_v57 = vld [vmem:[#allocation0 + $0x478] sm:$0x3] }
 0x19c   :  { %v2023_v58 = vpack.c.bf16 0.0, %v2022_v56  ;;  %v2037_v59 = vpack.c.bf16 0.0, %v2036_v57  ;;  %755 = vst.msk [vmem:[#allocation0 + $0x508] ss:$16 sm:$0x3] %vm243_vm0, %v3206_v60   ;;  %v1939_v4 = vpack.c.bf16 0.0, %v1938_v0 }
 0x19d   :  { %757 = vst.msk [vmem:[#allocation0 + $0x508] ss:$16 sm:$0xc] %vm243_vm0, %v3206_v60   ;;  %v1980_v3 = vld [vmem:[#allocation0 + $0x438] sm:$0x3]  ;;  %v1953_v6 = vpack.c.bf16 0.0, %v1952_v1 }
 0x19e   :  { %2981 = vst [vmem:[%s4478_s1 + $0x8d] sm:$0x1] %v2023_v58  ;;  %v1994_v5 = vld [vmem:[#allocation0 + $0x448] sm:$0x3]  ;;  %v2008_v7 = vld [vmem:[#allocation0 + $0x458] sm:$0x3] }
 0x19f   :  { %2983 = vst [vmem:[%s4478_s1 + $0x8f] sm:$0x1] %v2037_v59  ;;  %v1967_v8 = vpack.c.bf16 0.0, %v1966_v2  ;;  %v1981_v10 = vpack.c.bf16 0.0, %v1980_v3  ;;  %v1995_v12 = vpack.c.bf16 0.0, %v1994_v5  ;;  %v2009_v14 = vpack.c.bf16 0.0, %v2008_v7 }
 0x1a0   :  { %759 = vst.msk [vmem:[#allocation0 + $0x508] ss:$16 sm:$0x30] %vm243_vm0, %v3206_v60   ;;  %v2092_v15 = vld [vmem:[#allocation0 + $0x4b8] sm:$0x3] }
 0x1a1   :  { %761 = vst.msk [vmem:[#allocation0 + $0x508] ss:$16 sm:$0xc0] %vm243_vm0, %v3206_v60   ;;  %v2106_v17 = vld [vmem:[#allocation0 + $0x4c8] sm:$0x3]  ;;  %v2093_v21 = vpack.c.bf16 0.0, %v2092_v15 }
 0x1a2   :  { %1027 = vst.msk [vmem:[#allocation0 + $0x789] ss:$16 sm:$0x3] %vm243_vm0, %v3257_v62   ;;  %v2120_v19 = vld [vmem:[#allocation0 + $0x4d8] sm:$0x3]  ;;  %v2107_v22 = vpack.c.bf16 0.0, %v2106_v17 }
 0x1a3   :  { %1029 = vst.msk [vmem:[#allocation0 + $0x789] ss:$16 sm:$0xc] %vm243_vm0, %v3257_v62   ;;  %v2121_v23 = vpack.c.bf16 0.0, %v2120_v19 }
 0x1a4   :  { %1031 = vst.msk [vmem:[#allocation0 + $0x789] ss:$16 sm:$0x30] %vm243_vm0, %v3257_v62  }
 0x1a5   :  { %1033 = vst.msk [vmem:[#allocation0 + $0x789] ss:$16 sm:$0xc0] %vm243_vm0, %v3257_v62  }
 0x1a6   :  { %1014 = vst.msk [vmem:[#allocation0 + $0x709] ss:$16 sm:$0x3] %vm243_vm0, %v3256_v63  }
 0x1a7   :  { %1016 = vst.msk [vmem:[#allocation0 + $0x709] ss:$16 sm:$0xc] %vm243_vm0, %v3256_v63  }
 0x1a8   :  { %1018 = vst.msk [vmem:[#allocation0 + $0x709] ss:$16 sm:$0x30] %vm243_vm0, %v3256_v63  }
 0x1a9   :  { %1020 = vst.msk [vmem:[#allocation0 + $0x709] ss:$16 sm:$0xc0] %vm243_vm0, %v3256_v63  }
 0x1aa   :  { %2969 = vst [vmem:[%s4478_s1 + $0x81] sm:$0x1] %v1939_v4 }
 0x1ab   :  { %2971 = vst [vmem:[%s4478_s1 + $0x83] sm:$0x1] %v1953_v6 }
 0x1ac   :  { %2973 = vst [vmem:[%s4478_s1 + $0x85] sm:$0x1] %v1967_v8 }
 0x1ad   :  { %2975 = vst [vmem:[%s4478_s1 + $0x87] sm:$0x1] %v1981_v10 }
 0x1ae   :  { %2977 = vst [vmem:[%s4478_s1 + $0x89] sm:$0x1] %v1995_v12 }
 0x1af   :  { %2979 = vst [vmem:[%s4478_s1 + $0x8b] sm:$0x1] %v2009_v14 }
 0x1b0   :  { %2985 = vst [vmem:[%s4478_s1 + $0x91] sm:$0x1] %v2051_v16 }
 0x1b1   :  { %2987 = vst [vmem:[%s4478_s1 + $0x93] sm:$0x1] %v2065_v18 }
 0x1b2   :  { %2989 = vst [vmem:[%s4478_s1 + $0x95] sm:$0x1] %v2079_v20 }
 0x1b3   :  { %2991 = vst [vmem:[%s4478_s1 + $0x97] sm:$0x1] %v2093_v21 }
 0x1b4   :  { %2993 = vst [vmem:[%s4478_s1 + $0x99] sm:$0x1] %v2107_v22 }
 0x1b5   :  { %2995 = vst [vmem:[%s4478_s1 + $0x9b] sm:$0x1] %v2121_v23 }
 0x1b6   :  { %820 = vst.msk [vmem:[#allocation0 + $0x788] ss:$16 sm:$0x3] %vm243_vm0, %v3217_v24  }
 0x1b7   :  { %822 = vst.msk [vmem:[#allocation0 + $0x788] ss:$16 sm:$0xc] %vm243_vm0, %v3217_v24  }
 0x1b8   :  { %824 = vst.msk [vmem:[#allocation0 + $0x788] ss:$16 sm:$0x30] %vm243_vm0, %v3217_v24  }
 0x1b9   :  { %826 = vst.msk [vmem:[#allocation0 + $0x788] ss:$16 sm:$0xc0] %vm243_vm0, %v3217_v24  }
 0x1ba   :  { %807 = vst.msk [vmem:[#allocation0 + $0x708] ss:$16 sm:$0x3] %vm243_vm0, %v3216_v25  }
 0x1bb   :  { %809 = vst.msk [vmem:[#allocation0 + $0x708] ss:$16 sm:$0xc] %vm243_vm0, %v3216_v25  }
 0x1bc   :  { %811 = vst.msk [vmem:[#allocation0 + $0x708] ss:$16 sm:$0x30] %vm243_vm0, %v3216_v25  }
 0x1bd   :  { %813 = vst.msk [vmem:[#allocation0 + $0x708] ss:$16 sm:$0xc0] %vm243_vm0, %v3216_v25   ;;  %v2722_v1 = vld [vmem:[#allocation0 + $0x788] sm:$0x3]  ;;  %v3237_v25 = vunpack.i.h.bf16 %v4156_v46 }
 0x1be   :  { %845 = vst.msk [vmem:[#allocation0 + $0x89] ss:$16 sm:$0x3] %vm243_vm0, %v3222_v27   ;;  %v2736_v7 = vld [vmem:[#allocation0 + $0x798] sm:$0x3]  ;;  %v2723_v13 = vpack.c.bf16 0.0, %v2722_v1 }
 0x1bf   :  { %847 = vst.msk [vmem:[#allocation0 + $0x89] ss:$16 sm:$0xc] %vm243_vm0, %v3222_v27   ;;  %v2750_v9 = vld [vmem:[#allocation0 + $0x7a8] sm:$0x3]  ;;  %v2737_v15 = vpack.c.bf16 0.0, %v2736_v7 }
 0x1c0   :  { %849 = vst.msk [vmem:[#allocation0 + $0x89] ss:$16 sm:$0x30] %vm243_vm0, %v3222_v27   ;;  %v2764_v12 = vld [vmem:[#allocation0 + $0x7b8] sm:$0x3]  ;;  %v2751_v17 = vpack.c.bf16 0.0, %v2750_v9 }
 0x1c1   :  { %v2610_v28 = vld [vmem:[#allocation0 + $0x708] sm:$0x3]  ;;  %851 = vst.msk [vmem:[#allocation0 + $0x89] ss:$16 sm:$0xc0] %vm243_vm0, %v3222_v27   ;;  %v2765_v19 = vpack.c.bf16 0.0, %v2764_v12 }
 0x1c2   :  { %v2611_v30 = vpack.c.bf16 0.0, %v2610_v28  ;;  %832 = vst.msk [vmem:[#allocation0 + $0x9] ss:$16 sm:$0x3] %vm243_vm0, %v3221_v29   ;;  %v2624_v49 = vld [vmem:[#allocation0 + $0x718] sm:$0x3] }
 0x1c3   :  { %834 = vst.msk [vmem:[#allocation0 + $0x9] ss:$16 sm:$0xc] %vm243_vm0, %v3221_v29   ;;  %v2625_v51 = vpack.c.bf16 0.0, %v2624_v49  ;;  %v2638_v52 = vld [vmem:[#allocation0 + $0x728] sm:$0x3] }
 0x1c4   :  { %836 = vst.msk [vmem:[#allocation0 + $0x9] ss:$16 sm:$0x30] %vm243_vm0, %v3221_v29   ;;  %v2652_v53 = vld [vmem:[#allocation0 + $0x738] sm:$0x3]  ;;  %v2639_v54 = vpack.c.bf16 0.0, %v2638_v52  ;;  %v3246_v52 = vunpack.i.l.bf16 %v4203_v11 }
 0x1c5   :  { %v1154_v31 = vld [vmem:[#allocation0 + $0x88] sm:$0x3]  ;;  %v1168_v32 = vld [vmem:[#allocation0 + $0x98] sm:$0x3]  ;;  %3065 = vst [vmem:[%s4478_s1 + $0xe1] sm:$0x1] %v2611_v30 }
 0x1c6   :  { %v1155_v33 = vpack.c.bf16 0.0, %v1154_v31  ;;  %v1169_v34 = vpack.c.bf16 0.0, %v1168_v32  ;;  %v1182_v35 = vld [vmem:[#allocation0 + $0xa8] sm:$0x3]  ;;  %v1196_v36 = vld [vmem:[#allocation0 + $0xb8] sm:$0x3] }
 0x1c7   :  { %v1183_v37 = vpack.c.bf16 0.0, %v1182_v35  ;;  %v1197_v38 = vpack.c.bf16 0.0, %v1196_v36  ;;  %v1210_v39 = vld [vmem:[#allocation0 + $0xc8] sm:$0x3]  ;;  %v1224_v40 = vld [vmem:[#allocation0 + $0xd8] sm:$0x3] }
 0x1c8   :  { %2857 = vst [vmem:[%s4478_s1 + $0x11] sm:$0x1] %v1155_v33  ;;  %v1211_v41 = vpack.c.bf16 0.0, %v1210_v39  ;;  %v1238_v42 = vld [vmem:[#allocation0 + $0xe8] sm:$0x3]  ;;  %v1225_v43 = vpack.c.bf16 0.0, %v1224_v40 }
 0x1c9   :  { %2859 = vst [vmem:[%s4478_s1 + $0x13] sm:$0x1] %v1169_v34  ;;  %v1252_v44 = vld [vmem:[#allocation0 + $0xf8] sm:$0x3]  ;;  %v1239_v45 = vpack.c.bf16 0.0, %v1238_v42  ;;  %v2653_v58 = vpack.c.bf16 0.0, %v2652_v53  ;;  %v4292_v53 = vpop.permute.xlu1 %3249 }
 0x1ca   :  { %2861 = vst [vmem:[%s4478_s1 + $0x15] sm:$0x1] %v1183_v37  ;;  %v1253_v47 = vpack.c.bf16 0.0, %v1252_v44  ;;  %v2666_v55 = vld [vmem:[#allocation0 + $0x748] sm:$0x3] }
 0x1cb   :  { %2863 = vst [vmem:[%s4478_s1 + $0x17] sm:$0x1] %v1197_v38  ;;  %v2680_v61 = vld [vmem:[#allocation0 + $0x758] sm:$0x3]  ;;  %v2667_v62 = vpack.c.bf16 0.0, %v2666_v55 }
 0x1cc   :  { %2865 = vst [vmem:[%s4478_s1 + $0x19] sm:$0x1] %v1211_v41  ;;  %v2694_v63 = vld [vmem:[#allocation0 + $0x768] sm:$0x3]  ;;  %v2708_v0 = vld [vmem:[#allocation0 + $0x778] sm:$0x3] }
 0x1cd   :  { %2867 = vst [vmem:[%s4478_s1 + $0x1b] sm:$0x1] %v1225_v43  ;;  %v2681_v4 = vpack.c.bf16 0.0, %v2680_v61  ;;  %v2695_v8 = vpack.c.bf16 0.0, %v2694_v63  ;;  %v2709_v10 = vpack.c.bf16 0.0, %v2708_v0 }
 0x1ce   :  { %2869 = vst [vmem:[%s4478_s1 + $0x1d] sm:$0x1] %v1239_v45  ;;  %v2778_v14 = vld [vmem:[#allocation0 + $0x7c8] sm:$0x3]  ;;  %v2792_v16 = vld [vmem:[#allocation0 + $0x7d8] sm:$0x3] }
 0x1cf   :  { %2871 = vst [vmem:[%s4478_s1 + $0x1f] sm:$0x1] %v1253_v47  ;;  %v2806_v18 = vld [vmem:[#allocation0 + $0x7e8] sm:$0x3]  ;;  %v2820_v20 = vld [vmem:[#allocation0 + $0x7f8] sm:$0x3] }
 0x1d0   :  { %838 = vst.msk [vmem:[#allocation0 + $0x9] ss:$16 sm:$0xc0] %vm243_vm0, %v3221_v29   ;;  %v2779_v21 = vpack.c.bf16 0.0, %v2778_v14  ;;  %v2793_v22 = vpack.c.bf16 0.0, %v2792_v16  ;;  %v2807_v23 = vpack.c.bf16 0.0, %v2806_v18 }
 0x1d1   :  { %897 = vst.msk [vmem:[#allocation0 + $0x289] ss:$16 sm:$0x3] %vm243_vm0, %v3232_v48   ;;  %v2821_v24 = vpack.c.bf16 0.0, %v2820_v20  ;;  %v1042_v27 = vld [vmem:[#allocation0 + $0x8] sm:$0x3] }
 0x1d2   :  { %899 = vst.msk [vmem:[#allocation0 + $0x289] ss:$16 sm:$0xc] %vm243_vm0, %v3232_v48   ;;  %v1056_v28 = vld [vmem:[#allocation0 + $0x18] sm:$0x3]  ;;  %v1043_v31 = vpack.c.bf16 0.0, %v1042_v27 }
 0x1d3   :  { %901 = vst.msk [vmem:[#allocation0 + $0x289] ss:$16 sm:$0x30] %vm243_vm0, %v3232_v48   ;;  %v1070_v29 = vld [vmem:[#allocation0 + $0x28] sm:$0x3]  ;;  %v1057_v33 = vpack.c.bf16 0.0, %v1056_v28 }
 0x1d4   :  { %903 = vst.msk [vmem:[#allocation0 + $0x289] ss:$16 sm:$0xc0] %vm243_vm0, %v3232_v48   ;;  %v1084_v30 = vld [vmem:[#allocation0 + $0x38] sm:$0x3]  ;;  %v1071_v34 = vpack.c.bf16 0.0, %v1070_v29 }
 0x1d5   :  { %884 = vst.msk [vmem:[#allocation0 + $0x209] ss:$16 sm:$0x3] %vm243_vm0, %v3231_v50   ;;  %v1098_v32 = vld [vmem:[#allocation0 + $0x48] sm:$0x3]  ;;  %v1085_v35 = vpack.c.bf16 0.0, %v1084_v30 }
 0x1d6   :  { %886 = vst.msk [vmem:[#allocation0 + $0x209] ss:$16 sm:$0xc] %vm243_vm0, %v3231_v50   ;;  %v1112_v36 = vld [vmem:[#allocation0 + $0x58] sm:$0x3]  ;;  %v1099_v37 = vpack.c.bf16 0.0, %v1098_v32 }
 0x1d7   :  { %3067 = vst [vmem:[%s4478_s1 + $0xe3] sm:$0x1] %v2625_v51  ;;  %v1126_v38 = vld [vmem:[#allocation0 + $0x68] sm:$0x3]  ;;  %v1113_v41 = vpack.c.bf16 0.0, %v1112_v36  ;;  %v3247_v51 = vunpack.i.h.bf16 %v4203_v11 }
 0x1d8   :  { %888 = vst.msk [vmem:[#allocation0 + $0x209] ss:$16 sm:$0x30] %vm243_vm0, %v3231_v50   ;;  %v1140_v44 = vld [vmem:[#allocation0 + $0x78] sm:$0x3]  ;;  %v1127_v45 = vpack.c.bf16 0.0, %v1126_v38 }
 0x1d9   :  { %890 = vst.msk [vmem:[#allocation0 + $0x209] ss:$16 sm:$0xc0] %vm243_vm0, %v3231_v50   ;;  %v1141_v48 = vpack.c.bf16 0.0, %v1140_v44  ;;  %v1602_v27 = vld [vmem:[#allocation0 + $0x288] sm:$0x3] }
 0x1da   :  { %3069 = vst [vmem:[%s4478_s1 + $0xe5] sm:$0x1] %v2639_v54  ;;  %v1616_v29 = vld [vmem:[#allocation0 + $0x298] sm:$0x3] }
 0x1db   :  { %3071 = vst [vmem:[%s4478_s1 + $0xe7] sm:$0x1] %v2653_v58  ;;  %v1617_v36 = vpack.c.bf16 0.0, %v1616_v29 }
 0x1dc   :  { %v1490_v56 = vld [vmem:[#allocation0 + $0x208] sm:$0x3]  ;;  %v1504_v57 = vld [vmem:[#allocation0 + $0x218] sm:$0x3]  ;;  %3073 = vst [vmem:[%s4478_s1 + $0xe9] sm:$0x1] %v2667_v62 }
 0x1dd   :  { %v1491_v59 = vpack.c.bf16 0.0, %v1490_v56  ;;  %v1505_v60 = vpack.c.bf16 0.0, %v1504_v57  ;;  %3075 = vst [vmem:[%s4478_s1 + $0xeb] sm:$0x1] %v2681_v4 }
 0x1de   :  { %3077 = vst [vmem:[%s4478_s1 + $0xed] sm:$0x1] %v2695_v8 }
 0x1df   :  { %2905 = vst [vmem:[%s4478_s1 + $0x41] sm:$0x1] %v1491_v59 }
 0x1e0   :  { %2907 = vst [vmem:[%s4478_s1 + $0x43] sm:$0x1] %v1505_v60  ;;  %v1574_v2 = vld [vmem:[#allocation0 + $0x268] sm:$0x3]  ;;  %v1588_v3 = vld [vmem:[#allocation0 + $0x278] sm:$0x3] }
 0x1e1   :  { %v1575_v5 = vpack.c.bf16 0.0, %v1574_v2  ;;  %v1589_v6 = vpack.c.bf16 0.0, %v1588_v3  ;;  %3079 = vst [vmem:[%s4478_s1 + $0xef] sm:$0x1] %v2709_v10 }
 0x1e2   :  { %3081 = vst [vmem:[%s4478_s1 + $0xf1] sm:$0x1] %v2723_v13 }
 0x1e3   :  { %2917 = vst [vmem:[%s4478_s1 + $0x4d] sm:$0x1] %v1575_v5 }
 0x1e4   :  { %2919 = vst [vmem:[%s4478_s1 + $0x4f] sm:$0x1] %v1589_v6 }
 0x1e5   :  { %3083 = vst [vmem:[%s4478_s1 + $0xf3] sm:$0x1] %v2737_v15 }
 0x1e6   :  { %3085 = vst [vmem:[%s4478_s1 + $0xf5] sm:$0x1] %v2751_v17 }
 0x1e7   :  { %3087 = vst [vmem:[%s4478_s1 + $0xf7] sm:$0x1] %v2765_v19  ;;  %v1518_v19 = vld [vmem:[#allocation0 + $0x228] sm:$0x3] }
 0x1e8   :  { %3089 = vst [vmem:[%s4478_s1 + $0xf9] sm:$0x1] %v2779_v21  ;;  %v1532_v21 = vld [vmem:[#allocation0 + $0x238] sm:$0x3] }
 0x1e9   :  { %3091 = vst [vmem:[%s4478_s1 + $0xfb] sm:$0x1] %v2793_v22  ;;  %v1533_v28 = vpack.c.bf16 0.0, %v1532_v21 }
 0x1ea   :  { %3093 = vst [vmem:[%s4478_s1 + $0xfd] sm:$0x1] %v2807_v23  ;;  %v1546_v23 = vld [vmem:[#allocation0 + $0x248] sm:$0x3] }
 0x1eb   :  { %3095 = vst [vmem:[%s4478_s1 + $0xff] sm:$0x1] %v2821_v24  ;;  %v1547_v30 = vpack.c.bf16 0.0, %v1546_v23 }
 0x1ec   :  { %923 = vst.msk [vmem:[#allocation0 + $0x389] ss:$16 sm:$0x3] %vm243_vm0, %v3237_v25  }
 0x1ed   :  { %925 = vst.msk [vmem:[#allocation0 + $0x389] ss:$16 sm:$0xc] %vm243_vm0, %v3237_v25  }
 0x1ee   :  { %927 = vst.msk [vmem:[#allocation0 + $0x389] ss:$16 sm:$0x30] %vm243_vm0, %v3237_v25  }
 0x1ef   :  { %929 = vst.msk [vmem:[#allocation0 + $0x389] ss:$16 sm:$0xc0] %vm243_vm0, %v3237_v25   ;;  %v1560_v25 = vld [vmem:[#allocation0 + $0x258] sm:$0x3] }
 0x1f0   :  { %910 = vst.msk [vmem:[#allocation0 + $0x309] ss:$16 sm:$0x3] %vm243_vm0, %v3236_v26   ;;  %v1561_v32 = vpack.c.bf16 0.0, %v1560_v25 }
 0x1f1   :  { %912 = vst.msk [vmem:[#allocation0 + $0x309] ss:$16 sm:$0xc] %vm243_vm0, %v3236_v26  }
 0x1f2   :  { %914 = vst.msk [vmem:[#allocation0 + $0x309] ss:$16 sm:$0x30] %vm243_vm0, %v3236_v26  }
 0x1f3   :  { %916 = vst.msk [vmem:[#allocation0 + $0x309] ss:$16 sm:$0xc0] %vm243_vm0, %v3236_v26   ;;  %v1519_v26 = vpack.c.bf16 0.0, %v1518_v19  ;;  %v1840_v23 = vld [vmem:[#allocation0 + $0x398] sm:$0x3] }
 0x1f4   :  { %2841 = vst [vmem:[%s4478_s1 + $0x1] sm:$0x1] %v1043_v31  ;;  %v1630_v31 = vld [vmem:[#allocation0 + $0x2a8] sm:$0x3] }
 0x1f5   :  { %2843 = vst [vmem:[%s4478_s1 + $0x3] sm:$0x1] %v1057_v33  ;;  %v1644_v33 = vld [vmem:[#allocation0 + $0x2b8] sm:$0x3]  ;;  %v1631_v38 = vpack.c.bf16 0.0, %v1630_v31 }
 0x1f6   :  { %v1910_v39 = vld [vmem:[#allocation0 + $0x3e8] sm:$0x3]  ;;  %v1924_v40 = vld [vmem:[#allocation0 + $0x3f8] sm:$0x3]  ;;  %2845 = vst [vmem:[%s4478_s1 + $0x5] sm:$0x1] %v1071_v34 }
 0x1f7   :  { %v1911_v42 = vpack.c.bf16 0.0, %v1910_v39  ;;  %v1925_v43 = vpack.c.bf16 0.0, %v1924_v40  ;;  %2847 = vst [vmem:[%s4478_s1 + $0x7] sm:$0x1] %v1085_v35  ;;  %v1603_v34 = vpack.c.bf16 0.0, %v1602_v27  ;;  %v1645_v40 = vpack.c.bf16 0.0, %v1644_v33 }
 0x1f8   :  { %2849 = vst [vmem:[%s4478_s1 + $0x9] sm:$0x1] %v1099_v37  ;;  %v1658_v35 = vld [vmem:[#allocation0 + $0x2c8] sm:$0x3]  ;;  %v1672_v37 = vld [vmem:[#allocation0 + $0x2d8] sm:$0x3] }
 0x1f9   :  { %2965 = vst [vmem:[%s4478_s1 + $0x7d] sm:$0x1] %v1911_v42  ;;  %v1686_v39 = vld [vmem:[#allocation0 + $0x2e8] sm:$0x3]  ;;  %v1659_v42 = vpack.c.bf16 0.0, %v1658_v35 }
 0x1fa   :  { %2967 = vst [vmem:[%s4478_s1 + $0x7f] sm:$0x1] %v1925_v43  ;;  %v1798_v46 = vld [vmem:[#allocation0 + $0x368] sm:$0x3]  ;;  %v1812_v47 = vld [vmem:[#allocation0 + $0x378] sm:$0x3] }
 0x1fb   :  { %v1799_v49 = vpack.c.bf16 0.0, %v1798_v46  ;;  %v1813_v50 = vpack.c.bf16 0.0, %v1812_v47  ;;  %2851 = vst [vmem:[%s4478_s1 + $0xb] sm:$0x1] %v1113_v41  ;;  %v1700_v41 = vld [vmem:[#allocation0 + $0x2f8] sm:$0x3]  ;;  %v3252_v46 = vunpack.i.h.bf16 %v4292_v53 }
 0x1fc   :  { %2853 = vst [vmem:[%s4478_s1 + $0xd] sm:$0x1] %v1127_v45  ;;  %v1673_v43 = vpack.c.bf16 0.0, %v1672_v37  ;;  %v1687_v44 = vpack.c.bf16 0.0, %v1686_v39  ;;  %v1701_v45 = vpack.c.bf16 0.0, %v1700_v41 }
 0x1fd   :  { %2949 = vst [vmem:[%s4478_s1 + $0x6d] sm:$0x1] %v1799_v49  ;;  %v1714_v47 = vld [vmem:[#allocation0 + $0x308] sm:$0x3]  ;;  %v1868_v31 = vld [vmem:[#allocation0 + $0x3b8] sm:$0x3] }
 0x1fe   :  { %2951 = vst [vmem:[%s4478_s1 + $0x6f] sm:$0x1] %v1813_v50  ;;  %v1715_v49 = vpack.c.bf16 0.0, %v1714_v47  ;;  %v1770_v19 = vld [vmem:[#allocation0 + $0x348] sm:$0x3]  ;;  %v1869_v37 = vpack.c.bf16 0.0, %v1868_v31 }
 0x1ff   :  { %2855 = vst [vmem:[%s4478_s1 + $0xf] sm:$0x1] %v1141_v48  ;;  %v3251_v48 = vunpack.i.l.bf16 %v4292_v53  ;;  %v1854_v29 = vld [vmem:[#allocation0 + $0x3a8] sm:$0x3]  ;;  %v1896_v35 = vld [vmem:[#allocation0 + $0x3d8] sm:$0x3] }
 0x200   :  { %975 = vst.msk [vmem:[#allocation0 + $0x589] ss:$16 sm:$0x3] %vm243_vm0, %v3247_v51   ;;  %v1882_v33 = vld [vmem:[#allocation0 + $0x3c8] sm:$0x3]  ;;  %v1897_v39 = vpack.c.bf16 0.0, %v1896_v35 }
 0x201   :  { %977 = vst.msk [vmem:[#allocation0 + $0x589] ss:$16 sm:$0xc] %vm243_vm0, %v3247_v51  }
 0x202   :  { %979 = vst.msk [vmem:[#allocation0 + $0x589] ss:$16 sm:$0x30] %vm243_vm0, %v3247_v51  }
 0x203   :  { %981 = vst.msk [vmem:[#allocation0 + $0x589] ss:$16 sm:$0xc0] %vm243_vm0, %v3247_v51  }
 0x204   :  { %962 = vst.msk [vmem:[#allocation0 + $0x509] ss:$16 sm:$0x3] %vm243_vm0, %v3246_v52  }
 0x205   :  { %964 = vst.msk [vmem:[#allocation0 + $0x509] ss:$16 sm:$0xc] %vm243_vm0, %v3246_v52  }
 0x206   :  { %966 = vst.msk [vmem:[#allocation0 + $0x509] ss:$16 sm:$0x30] %vm243_vm0, %v3246_v52  }
 0x207   :  { %968 = vst.msk [vmem:[#allocation0 + $0x509] ss:$16 sm:$0xc0] %vm243_vm0, %v3246_v52   ;;  %v2274_v54 = vld [vmem:[#allocation0 + $0x588] sm:$0x3] }
 0x208   :  { %v2275_v55 = vpack.c.bf16 0.0, %v2274_v54  ;;  %v2288_v56 = vld [vmem:[#allocation0 + $0x598] sm:$0x3]  ;;  %v2302_v4 = vld [vmem:[#allocation0 + $0x5a8] sm:$0x3] }
 0x209   :  { %v2289_v57 = vpack.c.bf16 0.0, %v2288_v56  ;;  %v2316_v10 = vld [vmem:[#allocation0 + $0x5b8] sm:$0x3]  ;;  %v2330_v12 = vld [vmem:[#allocation0 + $0x5c8] sm:$0x3]  ;;  %v2303_v13 = vpack.c.bf16 0.0, %v2302_v4 }
 0x20a   :  { %3017 = vst [vmem:[%s4478_s1 + $0xb1] sm:$0x1] %v2275_v55  ;;  %v2344_v14 = vld [vmem:[#allocation0 + $0x5d8] sm:$0x3]  ;;  %v2317_v15 = vpack.c.bf16 0.0, %v2316_v10  ;;  %v2331_v17 = vpack.c.bf16 0.0, %v2330_v12 }
 0x20b   :  { %v2162_v58 = vld [vmem:[#allocation0 + $0x508] sm:$0x3]  ;;  %v2176_v59 = vld [vmem:[#allocation0 + $0x518] sm:$0x3]  ;;  %3019 = vst [vmem:[%s4478_s1 + $0xb3] sm:$0x1] %v2289_v57 }
 0x20c   :  { %v2163_v60 = vpack.c.bf16 0.0, %v2162_v58  ;;  %v2177_v61 = vpack.c.bf16 0.0, %v2176_v59  ;;  %v2190_v62 = vld [vmem:[#allocation0 + $0x528] sm:$0x3]  ;;  %v2204_v63 = vld [vmem:[#allocation0 + $0x538] sm:$0x3] }
 0x20d   :  { %v2191_v0 = vpack.c.bf16 0.0, %v2190_v62  ;;  %v2205_v1 = vpack.c.bf16 0.0, %v2204_v63  ;;  %v2218_v2 = vld [vmem:[#allocation0 + $0x548] sm:$0x3]  ;;  %v2232_v3 = vld [vmem:[#allocation0 + $0x558] sm:$0x3] }
 0x20e   :  { %3001 = vst [vmem:[%s4478_s1 + $0xa1] sm:$0x1] %v2163_v60  ;;  %v2219_v5 = vpack.c.bf16 0.0, %v2218_v2  ;;  %v2246_v6 = vld [vmem:[#allocation0 + $0x568] sm:$0x3]  ;;  %v2233_v7 = vpack.c.bf16 0.0, %v2232_v3 }
 0x20f   :  { %3003 = vst [vmem:[%s4478_s1 + $0xa3] sm:$0x1] %v2177_v61  ;;  %v2260_v8 = vld [vmem:[#allocation0 + $0x578] sm:$0x3]  ;;  %v2247_v9 = vpack.c.bf16 0.0, %v2246_v6  ;;  %v2345_v20 = vpack.c.bf16 0.0, %v2344_v14 }
 0x210   :  { %3005 = vst [vmem:[%s4478_s1 + $0xa5] sm:$0x1] %v2191_v0  ;;  %v2261_v11 = vpack.c.bf16 0.0, %v2260_v8  ;;  %v2358_v16 = vld [vmem:[#allocation0 + $0x5e8] sm:$0x3] }
 0x211   :  { %3007 = vst [vmem:[%s4478_s1 + $0xa7] sm:$0x1] %v2205_v1  ;;  %v2372_v18 = vld [vmem:[#allocation0 + $0x5f8] sm:$0x3]  ;;  %v2359_v22 = vpack.c.bf16 0.0, %v2358_v16 }
 0x212   :  { %3009 = vst [vmem:[%s4478_s1 + $0xa9] sm:$0x1] %v2219_v5  ;;  %v2373_v24 = vpack.c.bf16 0.0, %v2372_v18 }
 0x213   :  { %3011 = vst [vmem:[%s4478_s1 + $0xab] sm:$0x1] %v2233_v7 }
 0x214   :  { %3013 = vst [vmem:[%s4478_s1 + $0xad] sm:$0x1] %v2247_v9 }
 0x215   :  { %3015 = vst [vmem:[%s4478_s1 + $0xaf] sm:$0x1] %v2261_v11  ;;  %v1728_v11 = vld [vmem:[#allocation0 + $0x318] sm:$0x3] }
 0x216   :  { %3021 = vst [vmem:[%s4478_s1 + $0xb5] sm:$0x1] %v2303_v13  ;;  %v1742_v13 = vld [vmem:[#allocation0 + $0x328] sm:$0x3] }
 0x217   :  { %3023 = vst [vmem:[%s4478_s1 + $0xb7] sm:$0x1] %v2317_v15  ;;  %v1756_v15 = vld [vmem:[#allocation0 + $0x338] sm:$0x3]  ;;  %v1743_v18 = vpack.c.bf16 0.0, %v1742_v13 }
 0x218   :  { %3025 = vst [vmem:[%s4478_s1 + $0xb9] sm:$0x1] %v2331_v17  ;;  %v1729_v17 = vpack.c.bf16 0.0, %v1728_v11  ;;  %v1757_v21 = vpack.c.bf16 0.0, %v1756_v15 }
 0x219   :  { %3027 = vst [vmem:[%s4478_s1 + $0xbb] sm:$0x1] %v2345_v20  ;;  %v1826_v20 = vld [vmem:[#allocation0 + $0x388] sm:$0x3] }
 0x21a   :  { %3029 = vst [vmem:[%s4478_s1 + $0xbd] sm:$0x1] %v2359_v22  ;;  %v1784_v22 = vld [vmem:[#allocation0 + $0x358] sm:$0x3] }
 0x21b   :  { %3031 = vst [vmem:[%s4478_s1 + $0xbf] sm:$0x1] %v2373_v24 }
 0x21c   :  { %2909 = vst [vmem:[%s4478_s1 + $0x45] sm:$0x1] %v1519_v26  ;;  %v1771_v26 = vpack.c.bf16 0.0, %v1770_v19 }
 0x21d   :  { %2911 = vst [vmem:[%s4478_s1 + $0x47] sm:$0x1] %v1533_v28 }
 0x21e   :  { %2913 = vst [vmem:[%s4478_s1 + $0x49] sm:$0x1] %v1547_v30  ;;  %v1785_v30 = vpack.c.bf16 0.0, %v1784_v22 }
 0x21f   :  { %2915 = vst [vmem:[%s4478_s1 + $0x4b] sm:$0x1] %v1561_v32  ;;  %v1827_v32 = vpack.c.bf16 0.0, %v1826_v20 }
 0x220   :  { %2921 = vst [vmem:[%s4478_s1 + $0x51] sm:$0x1] %v1603_v34  ;;  %v1841_v34 = vpack.c.bf16 0.0, %v1840_v23 }
 0x221   :  { %2923 = vst [vmem:[%s4478_s1 + $0x53] sm:$0x1] %v1617_v36  ;;  %v1855_v36 = vpack.c.bf16 0.0, %v1854_v29 }
 0x222   :  { %2925 = vst [vmem:[%s4478_s1 + $0x55] sm:$0x1] %v1631_v38  ;;  %v1883_v38 = vpack.c.bf16 0.0, %v1882_v33 }
 0x223   :  { %2927 = vst [vmem:[%s4478_s1 + $0x57] sm:$0x1] %v1645_v40 }
 0x224   :  { %2929 = vst [vmem:[%s4478_s1 + $0x59] sm:$0x1] %v1659_v42 }
 0x225   :  { %2931 = vst [vmem:[%s4478_s1 + $0x5b] sm:$0x1] %v1673_v43 }
 0x226   :  { %2933 = vst [vmem:[%s4478_s1 + $0x5d] sm:$0x1] %v1687_v44 }
 0x227   :  { %2935 = vst [vmem:[%s4478_s1 + $0x5f] sm:$0x1] %v1701_v45 }
 0x228   :  { %1001 = vst.msk [vmem:[#allocation0 + $0x689] ss:$16 sm:$0x3] %vm243_vm0, %v3252_v46  }
 0x229   :  { %1003 = vst.msk [vmem:[#allocation0 + $0x689] ss:$16 sm:$0xc] %vm243_vm0, %v3252_v46  }
 0x22a   :  { %1005 = vst.msk [vmem:[#allocation0 + $0x689] ss:$16 sm:$0x30] %vm243_vm0, %v3252_v46  }
 0x22b   :  { %1007 = vst.msk [vmem:[#allocation0 + $0x689] ss:$16 sm:$0xc0] %vm243_vm0, %v3252_v46  }
 0x22c   :  { %988 = vst.msk [vmem:[#allocation0 + $0x609] ss:$16 sm:$0x3] %vm243_vm0, %v3251_v48  }
 0x22d   :  { %990 = vst.msk [vmem:[#allocation0 + $0x609] ss:$16 sm:$0xc] %vm243_vm0, %v3251_v48  }
 0x22e   :  { %992 = vst.msk [vmem:[#allocation0 + $0x609] ss:$16 sm:$0x30] %vm243_vm0, %v3251_v48  }
 0x22f   :  { %v2498_v50 = vld [vmem:[#allocation0 + $0x688] sm:$0x3]  ;;  %v2512_v51 = vld [vmem:[#allocation0 + $0x698] sm:$0x3]  ;;  %2937 = vst [vmem:[%s4478_s1 + $0x61] sm:$0x1] %v1715_v49 }
 0x230   :  { %v2499_v52 = vpack.c.bf16 0.0, %v2498_v50  ;;  %v2513_v53 = vpack.c.bf16 0.0, %v2512_v51  ;;  %v2526_v54 = vld [vmem:[#allocation0 + $0x6a8] sm:$0x3]  ;;  %v2540_v55 = vld [vmem:[#allocation0 + $0x6b8] sm:$0x3] }
 0x231   :  { %v2527_v56 = vpack.c.bf16 0.0, %v2526_v54  ;;  %v2541_v57 = vpack.c.bf16 0.0, %v2540_v55  ;;  %v2554_v58 = vld [vmem:[#allocation0 + $0x6c8] sm:$0x3]  ;;  %v2568_v59 = vld [vmem:[#allocation0 + $0x6d8] sm:$0x3] }
 0x232   :  { %3049 = vst [vmem:[%s4478_s1 + $0xd1] sm:$0x1] %v2499_v52  ;;  %v2555_v60 = vpack.c.bf16 0.0, %v2554_v58  ;;  %v2582_v61 = vld [vmem:[#allocation0 + $0x6e8] sm:$0x3]  ;;  %v2569_v62 = vpack.c.bf16 0.0, %v2568_v59 }
 0x233   :  { %3051 = vst [vmem:[%s4478_s1 + $0xd3] sm:$0x1] %v2513_v53  ;;  %v2596_v63 = vld [vmem:[#allocation0 + $0x6f8] sm:$0x3]  ;;  %v2583_v0 = vpack.c.bf16 0.0, %v2582_v61 }
 0x234   :  { %3053 = vst [vmem:[%s4478_s1 + $0xd5] sm:$0x1] %v2527_v56  ;;  %v2386_v1 = vld [vmem:[#allocation0 + $0x608] sm:$0x3]  ;;  %v2597_v2 = vpack.c.bf16 0.0, %v2596_v63 }
 0x235   :  { %3055 = vst [vmem:[%s4478_s1 + $0xd7] sm:$0x1] %v2541_v57  ;;  %v2400_v3 = vld [vmem:[#allocation0 + $0x618] sm:$0x3]  ;;  %v2414_v4 = vld [vmem:[#allocation0 + $0x628] sm:$0x3] }
 0x236   :  { %3057 = vst [vmem:[%s4478_s1 + $0xd9] sm:$0x1] %v2555_v60  ;;  %v2387_v5 = vpack.c.bf16 0.0, %v2386_v1  ;;  %v2428_v6 = vld [vmem:[#allocation0 + $0x638] sm:$0x3]  ;;  %v2401_v7 = vpack.c.bf16 0.0, %v2400_v3 }
 0x237   :  { %3059 = vst [vmem:[%s4478_s1 + $0xdb] sm:$0x1] %v2569_v62  ;;  %v2442_v8 = vld [vmem:[#allocation0 + $0x648] sm:$0x3]  ;;  %v2415_v9 = vpack.c.bf16 0.0, %v2414_v4  ;;  %v2429_v12 = vpack.c.bf16 0.0, %v2428_v6 }
 0x238   :  { %3061 = vst [vmem:[%s4478_s1 + $0xdd] sm:$0x1] %v2583_v0  ;;  %v2456_v10 = vld [vmem:[#allocation0 + $0x658] sm:$0x3]  ;;  %v2443_v14 = vpack.c.bf16 0.0, %v2442_v8 }
 0x239   :  { %3063 = vst [vmem:[%s4478_s1 + $0xdf] sm:$0x1] %v2597_v2  ;;  %v2457_v16 = vpack.c.bf16 0.0, %v2456_v10 }
 0x23a   :  { %994 = vst.msk [vmem:[#allocation0 + $0x609] ss:$16 sm:$0xc0] %vm243_vm0, %v3251_v48  }
 0x23b   :  { %3033 = vst [vmem:[%s4478_s1 + $0xc1] sm:$0x1] %v2387_v5 }
 0x23c   :  { %3035 = vst [vmem:[%s4478_s1 + $0xc3] sm:$0x1] %v2401_v7 }
 0x23d   :  { %3037 = vst [vmem:[%s4478_s1 + $0xc5] sm:$0x1] %v2415_v9 }
 0x23e   :  { %3039 = vst [vmem:[%s4478_s1 + $0xc7] sm:$0x1] %v2429_v12 }
 0x23f   :  { %3041 = vst [vmem:[%s4478_s1 + $0xc9] sm:$0x1] %v2443_v14 }
 0x240   :  { %3043 = vst [vmem:[%s4478_s1 + $0xcb] sm:$0x1] %v2457_v16 }
 0x241   :  { %v2470_v24 = vld [vmem:[#allocation0 + $0x668] sm:$0x3]  ;;  %v2484_v25 = vld [vmem:[#allocation0 + $0x678] sm:$0x3]  ;;  %2939 = vst [vmem:[%s4478_s1 + $0x63] sm:$0x1] %v1729_v17 }
 0x242   :  { %v2471_v27 = vpack.c.bf16 0.0, %v2470_v24  ;;  %v2485_v28 = vpack.c.bf16 0.0, %v2484_v25  ;;  %2941 = vst [vmem:[%s4478_s1 + $0x65] sm:$0x1] %v1743_v18 }
 0x243   :  { %2943 = vst [vmem:[%s4478_s1 + $0x67] sm:$0x1] %v1757_v21 }
 0x244   :  { %3045 = vst [vmem:[%s4478_s1 + $0xcd] sm:$0x1] %v2471_v27 }
 0x245   :  { %3047 = vst [vmem:[%s4478_s1 + $0xcf] sm:$0x1] %v2485_v28 }
 0x246   :  { %2945 = vst [vmem:[%s4478_s1 + $0x69] sm:$0x1] %v1771_v26 }
 0x247   :  { %2947 = vst [vmem:[%s4478_s1 + $0x6b] sm:$0x1] %v1785_v30 }
 0x248   :  { %2953 = vst [vmem:[%s4478_s1 + $0x71] sm:$0x1] %v1827_v32 }
 0x249   :  { %2955 = vst [vmem:[%s4478_s1 + $0x73] sm:$0x1] %v1841_v34 }
 0x24a   :  { %2957 = vst [vmem:[%s4478_s1 + $0x75] sm:$0x1] %v1855_v36 }
 0x24b   :  { %2959 = vst [vmem:[%s4478_s1 + $0x77] sm:$0x1] %v1869_v37 }
 0x24c   :  { %2961 = vst [vmem:[%s4478_s1 + $0x79] sm:$0x1] %v1883_v38 }
 0x24d   :  { %2963 = vst [vmem:[%s4478_s1 + $0x7b] sm:$0x1] %v1897_v39 }

// kernel: _forward.1
= control target key start
LH: loop header
LB: loop body
LE: loop exit
PB: predicated region body
PF: predicated region fallthrough
CT: control target
= control target key end

     0   :  { %s1054_s12 = smov 0   ;;  %s1056_s13 = smov 0   ;;  %s1201_s0 = inlined_call_operand.vmem [shape: bf16[2,2,9,9,32], index: 0, kind: input, shape index: {}]   ;;  %s1202_s1 = inlined_call_operand.vmem [shape: bf16[2,128,128], index: 1, kind: input, shape index: {}]   ;;  %s1203_s2 = inlined_call_operand.vmem [shape: f32[2,1,128], index: 2, kind: input, shape index: {}]   ;;  %s1204_s3 = inlined_call_operand.vmem [shape: bf16[2,2,64,128], index: 3, kind: output, shape index: {}]  }
   0x1   :  { %s1058_s14 = smov 0   ;;  %s1060_s15 = smov 0  }
   0x2   :  { %s1062_s16 = smov 0  }
   0x3 LB: > { %s22_s17 = sadd.s32 1, %s1024_s14  ;;  %s25_s18 = sadd.s32 1, %s1028_s15  ;;  %s1032_s16 = sphi %s1062_s16, %s13_s16   ;;  %s1028_s15 = sphi %s1060_s15, %s1208_s15   ;;  %s1024_s14 = sphi %s1058_s14, %s1207_s14   ;;  %s1020_s13 = sphi %s1056_s13, %s1206_s13   ;;  %s1016_s12 = sphi %s1054_s12, %s1205_s12  }
   0x4   : > { %p23_p0 = scmp.ge.s32.totalorder %s22_s17, 2  ;;  %p835_p1 = scmp.ge.s32.totalorder %s1032_s16, 1 }
   0x5   : > { %p175_p2 = scmp.lt.s32.totalorder %s1032_s16, 5 }
   0x6   : > { %s1210_s17 = smov (%p23_p0, %s22_s17), 0  ;;  %s1212_s18 = smov (!%p23_p0, %s25_s18), %s1028_s15 }
   0x7   : > { %p176_p3 = pnand %p835_p1, %p175_p2  ;;  %p27_p4 = scmp.ge.s32.totalorder %s1212_s18, 2 }
   0x8   : > { %p215_p5 = scmp.lt.s32.totalorder (!%p176_p3), %s1020_s13, 1  ;;  %p217_p6 = scmp.lt.s32.totalorder (!%p176_p3), %s1016_s12, 1 }
   0x9   : > { %s1214_s18 = smov (%p27_p4, %s1212_s18), 0  ;;  %179 = sbr.rel (%p176_p3) target bundleno = 229 (0xe5), region = 32 }
   0xe   : > { %s1216_s13 = smov (!%p215_p5, %s1020_s13), 1  ;;  %s1218_s12 = smov (!%p217_p6, %s1016_s12), 1  ;;  %vm269_vm0 = vcmask 1043456   ;;  %vm414_vm1 = vcmask 261120  }
   0xf   : > { %s952_s19 = smul.u32 36, %s1216_s13  ;;  %s917_s20 = sshll.u32 %s1216_s13, 6 }
  0x10   : > { %s951_s21 = smul.u32 18, %s1218_s12  ;;  %s228_s24 = scalar_lea.vmem %s1202_s1, %s917_s20 }
  0x11   : > { %v919_v0 = vld [vmem:[%s228_s24 + $0x8] sm:$0xff]  ;;  %v922_v2 = vld [vmem:[%s228_s24 + $0x18] sm:$0xff]  ;;  %v918_v4 = vld [vmem:[%s228_s24] sm:$0xff]  ;;  %s231_s5 = scalar_lea.vmem %s1203_s2, %s1216_s13  ;;  %s839_s6 = sshll.u32 %s1218_s12, 3 }
  0x12   : > { %v924_v1 = vld [vmem:[%s228_s24 + $0x28] sm:$0xff]  ;;  %s221_s25 = sadd.s32 %s952_s19, %s951_s21  ;;  %v927_v3 = vld [vmem:[%s228_s24 + $0x38] sm:$0xff]  ;;  %478 = vmatpush.bf16.msra.mxu1 %v919_v0  ;;  %v923_v5 = vld [vmem:[%s228_s24 + $0x20] sm:$0xff]  ;;  %429 = vmatpush.bf16.msra.mxu0 %v922_v2  ;;  %s840_s7 = sshll.u32 %s1216_s13, 4 }
  0x13   : > { %s836_s26 = sshll.u32 %s221_s25, 2  ;;  %551 = vmatpush.bf16.msra.mxu2 %v924_v1  ;;  %656 = vmatpush.bf16.msra.mxu3 %v927_v3  ;;  %v921_v6 = vld [vmem:[%s228_s24 + $0x10] sm:$0xff]  ;;  %s1141_s8 = sadd.s32 %s840_s7, %s839_s6 }
  0x14   : > { %s1097_s29 = scalar_lea.vmem %s1201_s0, %s836_s26  ;;  %v926_v7 = vld [vmem:[%s228_s24 + $0x30] sm:$0xff]  ;;  %s841_s11 = sshll.u32 %s1141_s8, 2 }
  0x15   : > { %v242_v8 = vld [vmem:[%s1097_s29] sm:$0xf]  ;;  %v842_v9 = vld [vmem:[%s1097_s29 + $0x8] sm:$0xf]  ;;  %v849_v10 = vld [vmem:[%s1097_s29 + $0xc] sm:$0x1]  ;;  %s1180_s20 = scalar_lea.vmem %s1204_s3, %s841_s11 }
  0x16   : > { %v258_v11 = vunpack.c.l.b16 %v842_v9  ;;  %v307_v12 = vunpack.c.l.b16 %v849_v10  ;;  %v1103_v13 = vld [vmem:[%s1097_s29 + $0x10] sm:$0xf]  ;;  %v850_v14 = vld [vmem:[%s1097_s29 + $0x14] sm:$0x1]  ;;  %v858_v15 = vld [vmem:[%s1097_s29] sm:$0xf]  ;;  %479 = vmatpush.bf16.msra.mxu1 %v918_v4  ;;  %430 = vmatpush.bf16.msra.mxu0 %v921_v6 }
  0x17   : > { %552 = vmatpush.bf16.msra.mxu2 %v923_v5  ;;  %v319_v16 = vunpack.c.l.b16 %v1103_v13  ;;  %v320_v17 = vunpack.c.l.b16 %v850_v14  ;;  %v920_v18 = vld [vmem:[%s1097_s29] sm:$0x10]  ;;  %v844_v19 = vld [vmem:[%s1097_s29 + $0x18] sm:$0xf]  ;;  %v851_v20 = vld [vmem:[%s1097_s29 + $0x1c] sm:$0x1]  ;;  %657 = vmatpush.bf16.msra.mxu3 %v926_v7 }
  0x18   : > { %v259_v21 = vpack.c.b16 %v258_v11, %v258_v11  ;;  %v308_v22 = vpack.c.b16 %v307_v12, %v258_v11  ;;  %v859_v23 = vor.u32 %v920_v18, %v858_v15  ;;  %v261_v26 = vunpack.c.l.b16 %v844_v19  ;;  %v1112_v28 = vld [vmem:[%s1097_s29 + $0x20] sm:$0xf]  ;;  %v852_v37 = vld [vmem:[%s1097_s29 + $0x24] sm:$0x1]  ;;  %v846_v62 = vld [vmem:[%s1097_s29 + $0x28] sm:$0xf] }
  0x19   : > { %v321_v24 = vpack.c.b16 %v320_v17, %v319_v16  ;;  %v503_v25 = vpack.c.b16 %v319_v16, %v319_v16  ;;  %v330_v27 = vunpack.c.l.b16 %v851_v20  ;;  %v342_v40 = vunpack.c.l.b16 %v1112_v28  ;;  %v853_v63 = vld [vmem:[%s1097_s29 + $0x2c] sm:$0x1]  ;;  %v1131_v4 = vld [vmem:[%s1097_s29 + $0x30] sm:$0xf]  ;;  %v854_v6 = vld [vmem:[%s1097_s29 + $0x34] sm:$0x1] }
  0x1a   : > { %v272_v29 = vsel %vm269_vm0, %v242_v8, %v259_v21  ;;  %v300_v30 = vshrl.u32 %v859_v23, 16  ;;  %v302_v31 = vshll.u32 %v859_v23, 16  ;;  %v310_v32 = vshrl.u32 %v308_v22, 16 }
  0x1b   : > { %880 = vmatmul.msk.bf16.vlgmr.msra.gmra.mxu1 %vm414_vm1, %v272_v29  ;;  %v511_v33 = vsel %vm269_vm0, %v842_v9, %v503_v25  ;;  %v313_v34 = vshll.u32 %v308_v22, 16  ;;  %v323_v35 = vshrl.u32 %v321_v24, 16  ;;  %v325_v36 = vshll.u32 %v321_v24, 16 }
  0x1c   : > { %893 = vmatmul.msk.bf16.vlgmr.msra.gmra.mxu2 %vm414_vm1, %v511_v33  ;;  %v304_v38 = vrot.slane %v302_v31, 1  ;;  %v312_v39 = vrot.slane %v310_v32, 4  ;;  %v331_v46 = vpack.c.b16 %v330_v27, %v261_v26  ;;  %v343_v47 = vunpack.c.l.b16 %v852_v37  ;;  %v848_v33 = vld [vmem:[%s1097_s29 + $0x38] sm:$0xf] }
  0x1d   : > { %v315_v41 = vrot.slane %v313_v34, 5  ;;  %v584_v42 = vrot.slane %v313_v34, 1  ;;  %v586_v43 = vrot.slane %v323_v35, 4  ;;  %v587_v44 = vrot.slane %v325_v36, 5 }
  0x1e   : > { %v305_v45 = vor.u32 %v304_v38, %v300_v30  ;;  %v344_v51 = vpack.c.b16 %v343_v47, %v342_v40  ;;  %v333_v54 = vshrl.u32 %v331_v46, 16  ;;  %v336_v55 = vshll.u32 %v331_v46, 16 }
  0x1f   : > { %v316_v48 = vor.u32 %v315_v41, %v312_v39  ;;  %v585_v49 = vor.u32 %v584_v42, %v310_v32  ;;  %v588_v50 = vor.u32 %v587_v44, %v586_v43  ;;  %v262_v58 = vpack.c.b16 %v261_v26, %v261_v26  ;;  %v901_v43 = vld [vmem:[%s1097_s29 + $0x40] sm:$0xf]  ;;  %v925_v44 = vld [vmem:[%s1097_s29 + $0x40] sm:$0x10] }
  0x20   : > { %v346_v56 = vshrl.u32 %v344_v51, 16  ;;  %v348_v57 = vshll.u32 %v344_v51, 16  ;;  %v504_v59 = vpack.c.b16 %v342_v40, %v342_v40  ;;  %v327_v60 = vrot.slane %v325_v36, 1 }
  0x21   : > { %v388_v52 = vsel %vm269_vm0, %v305_v45, %v316_v48  ;;  %v616_v53 = vsel %vm269_vm0, %v585_v49, %v588_v50  ;;  %v335_v61 = vrot.slane %v333_v54, 4  ;;  %v338_v0 = vrot.slane %v336_v55, 5  ;;  %v884_v45 = vld [vmem:[%s1097_s29 + $0x40] sm:$0xf] }
  0x22   : > { %868 = vmatmul.msk.bf16.vlgmr.msra.gmra.mxu0 %vm414_vm1, %v388_v52  ;;  %911 = vmatmul.msk.bf16.vlgmr.msra.gmra.mxu3 %vm414_vm1, %v616_v53  ;;  %v589_v1 = vrot.slane %v336_v55, 1  ;;  %v591_v2 = vrot.slane %v346_v56, 4  ;;  %v592_v3 = vrot.slane %v348_v57, 5  ;;  %v275_v5 = vsel %vm269_vm0, %v1103_v13, %v262_v58 }
  0x23   : > { %v514_v7 = vsel %vm269_vm0, %v844_v19, %v504_v59  ;;  %v328_v8 = vor.u32 %v327_v60, %v323_v35  ;;  %v264_v9 = vunpack.c.l.b16 %v846_v62  ;;  %v353_v10 = vunpack.c.l.b16 %v853_v63  ;;  %v855_v35 = vld [vmem:[%s1097_s29 + $0x3c] sm:$0x1] }
  0x24   : > { %v365_v11 = vunpack.c.l.b16 %v1131_v4  ;;  %v339_v12 = vor.u32 %v338_v0, %v335_v61  ;;  %v590_v14 = vor.u32 %v589_v1, %v333_v54  ;;  %v593_v15 = vor.u32 %v592_v3, %v591_v2 }
  0x25   : > { %v366_v16 = vunpack.c.l.b16 %v854_v6  ;;  %v354_v13 = vpack.c.b16 %v353_v10, %v264_v9  ;;  %v265_v24 = vpack.c.b16 %v264_v9, %v264_v9  ;;  %v350_v26 = vrot.slane %v348_v57, 1 }
  0x26   : > { %v391_v17 = vsel %vm269_vm0, %v328_v8, %v339_v12  ;;  %v619_v18 = vsel %vm269_vm0, %v590_v14, %v593_v15  ;;  %v505_v25 = vpack.c.b16 %v365_v11, %v365_v11  ;;  %v267_v38 = vunpack.c.l.b16 %v848_v33 }
  0x27   : > { %v367_v19 = vpack.c.b16 %v366_v16, %v365_v11  ;;  %v356_v20 = vshrl.u32 %v354_v13, 16  ;;  %v359_v21 = vshll.u32 %v354_v13, 16  ;;  %v278_v34 = vsel %vm269_vm0, %v1112_v28, %v265_v24 }
  0x28   : > { %v517_v36 = vsel %vm269_vm0, %v846_v62, %v505_v25  ;;  %v351_v37 = vor.u32 %v350_v26, %v346_v56  ;;  %v376_v42 = vunpack.c.l.b16 %v855_v35  ;;  %v902_v46 = vor.u32 %v925_v44, %v901_v43 }
  0x29   : > { %v369_v22 = vshrl.u32 %v367_v19, 16  ;;  %v371_v23 = vshll.u32 %v367_v19, 16  ;;  %v358_v27 = vrot.slane %v356_v20, 4  ;;  %v361_v29 = vrot.slane %v359_v21, 5 }
  0x2a   : > { %v594_v30 = vrot.slane %v359_v21, 1  ;;  %v377_v48 = vpack.c.b16 %v376_v42, %v267_v38  ;;  %v507_v49 = vunpack.c.l.b16 %v884_v45  ;;  %v607_v50 = vshrl.u32 %v902_v46, 16 }
  0x2b   : > { %881 = vmatmul.msk.bf16.gmra.mxu1 %vm414_vm1, %v275_v5  ;;  %v596_v31 = vrot.slane %v369_v22, 4  ;;  %v597_v32 = vrot.slane %v371_v23, 5  ;;  %v362_v39 = vor.u32 %v361_v29, %v358_v27  ;;  %v610_v53 = vshll.u32 %v902_v46, 16 }
  0x2c   : > { %894 = vmatmul.msk.bf16.gmra.mxu2 %vm414_vm1, %v514_v7  ;;  %v595_v40 = vor.u32 %v594_v30, %v356_v20  ;;  %v379_v51 = vshrl.u32 %v377_v48, 16  ;;  %v382_v52 = vshll.u32 %v377_v48, 16  ;;  %v268_v54 = vpack.c.b16 %v267_v38, %v267_v38 }
  0x2d   : > { %v598_v41 = vor.u32 %v597_v32, %v596_v31  ;;  %v394_v47 = vsel %vm269_vm0, %v351_v37, %v362_v39  ;;  %v508_v55 = vpack.c.b16 %v507_v49, %v507_v49  ;;  %v373_v56 = vrot.slane %v371_v23, 1 }
  0x2e   : > { %v609_v57 = vrot.slane %v607_v50, 4  ;;  %v381_v58 = vrot.slane %v379_v51, 4  ;;  %v384_v59 = vrot.slane %v382_v52, 5  ;;  %v599_v60 = vrot.slane %v382_v52, 1 }
  0x2f   : > { %v622_v28 = vsel %vm269_vm0, %v595_v40, %v598_v41  ;;  %v612_v61 = vrot.slane %v610_v53, 5  ;;  %v281_v62 = vsel %vm269_vm0, %v1131_v4, %v268_v54  ;;  %v520_v63 = vsel %vm269_vm0, %v848_v33, %v508_v55 }
  0x30   : > { %v374_v0 = vor.u32 %v373_v56, %v369_v22  ;;  %v385_v1 = vor.u32 %v384_v59, %v381_v58  ;;  %v600_v2 = vor.u32 %v599_v60, %v379_v51 }
  0x31   : > { %v613_v3 = vor.u32 %v612_v61, %v609_v57 }
  0x32   : > { %869 = vmatmul.msk.bf16.gmra.mxu0 %vm414_vm1, %v391_v17  ;;  %912 = vmatmul.msk.bf16.gmra.mxu3 %vm414_vm1, %v619_v18  ;;  %v397_v5 = vsel %vm269_vm0, %v374_v0, %v385_v1  ;;  %v993_v18 = vld [vmem:[%s231_s5] ss:$0 sm:$0xff] }
  0x33   : > { %v625_v6 = vsel %vm269_vm0, %v600_v2, %v613_v3 }
  0x3b   : > { %882 = vmatmul.msk.bf16.gmra.mxu1 %vm414_vm1, %v278_v34 }
  0x3c   : > { %895 = vmatmul.msk.bf16.gmra.mxu2 %vm414_vm1, %v517_v36 }
  0x42   : > { %870 = vmatmul.msk.bf16.gmra.mxu0 %vm414_vm1, %v394_v47  ;;  %913 = vmatmul.msk.bf16.gmra.mxu3 %vm414_vm1, %v622_v28 }
  0x4b   : > { %883 = vmatmul.msk.bf16.gmra.mxu1 %vm414_vm1, %v281_v62 }
  0x4c   : > { %896 = vmatmul.msk.bf16.gmra.mxu2 %vm414_vm1, %v520_v63 }
  0x52   : > { %871 = vmatmul.msk.bf16.gmra.mxu0 %vm414_vm1, %v397_v5  ;;  %914 = vmatmul.msk.bf16.gmra.mxu3 %vm414_vm1, %v625_v6 }
  0x98   : > { %v481_v4 = vpop.f32.mrf.mxu1 }
  0x9f   : > { %v432_v7 = vpop.f32.mrf.mxu0  ;;  %v554_v8 = vpop.f32.mrf.mxu2 }
  0xa0   : > { %v483_v9 = vpop.f32.mrf.mxu1  ;;  %v482_v10 = vadd.f32 %v481_v4, %v432_v7 }
  0xa2   : > { %v574_v15 = vadd.f32 %v554_v8, %v482_v10 }
  0xa5   : > { %v659_v11 = vpop.f32.mrf.mxu3 }
  0xa6   : > { %v679_v17 = vadd.f32 %v659_v11, %v574_v15 }
  0xa7   : > { %v434_v12 = vpop.f32.mrf.mxu0  ;;  %v556_v14 = vpop.f32.mrf.mxu2 }
  0xa8   : > { %v484_v16 = vadd.f32 %v483_v9, %v434_v12  ;;  %v486_v13 = vpop.f32.mrf.mxu1  ;;  %v691_v24 = vadd.f32 %v993_v18, %v679_v17 }
  0xaa   : > { %v575_v19 = vadd.f32 %v556_v14, %v484_v16 }
  0xad   : > { %v661_v20 = vpop.f32.mrf.mxu3 }
  0xae   : > { %v680_v21 = vadd.f32 %v661_v20, %v575_v19 }
  0xaf   : > { %v437_v22 = vpop.f32.mrf.mxu0  ;;  %v559_v23 = vpop.f32.mrf.mxu2 }
  0xb0   : > { %v692_v25 = vadd.f32 %v993_v18, %v680_v21  ;;  %v488_v26 = vpop.f32.mrf.mxu1  ;;  %v487_v29 = vadd.f32 %v486_v13, %v437_v22 }
  0xb2   : > { %v931_v27 = vpack.c.bf16 %v692_v25, %v691_v24  ;;  %v576_v33 = vadd.f32 %v559_v23, %v487_v29 }
  0xb4   : > { %932 = vst [vmem:[%s1180_s20] sm:$0xff] %v931_v27  }
  0xb5   : > { %v664_v30 = vpop.f32.mrf.mxu3 }
  0xb6   : > { %v681_v36 = vadd.f32 %v664_v30, %v576_v33 }
  0xb7   : > { %v439_v31 = vpop.f32.mrf.mxu0  ;;  %v561_v32 = vpop.f32.mrf.mxu2 }
  0xb8   : > { %v489_v34 = vadd.f32 %v488_v26, %v439_v31  ;;  %v491_v35 = vpop.f32.mrf.mxu1  ;;  %v693_v42 = vadd.f32 %v993_v18, %v681_v36 }
  0xba   : > { %v577_v37 = vadd.f32 %v561_v32, %v489_v34 }
  0xbd   : > { %v666_v38 = vpop.f32.mrf.mxu3 }
  0xbe   : > { %v682_v39 = vadd.f32 %v666_v38, %v577_v37 }
  0xbf   : > { %v442_v40 = vpop.f32.mrf.mxu0  ;;  %v564_v41 = vpop.f32.mrf.mxu2 }
  0xc0   : > { %v694_v43 = vadd.f32 %v993_v18, %v682_v39  ;;  %v493_v45 = vpop.f32.mrf.mxu1  ;;  %v492_v46 = vadd.f32 %v491_v35, %v442_v40 }
  0xc2   : > { %v936_v44 = vpack.c.bf16 %v694_v43, %v693_v42  ;;  %v578_v49 = vadd.f32 %v564_v41, %v492_v46 }
  0xc4   : > { %948 = vst [vmem:[%s1180_s20 + $0x8] sm:$0xff] %v936_v44  }
  0xc5   : > { %v669_v47 = vpop.f32.mrf.mxu3 }
  0xc6   : > { %v683_v51 = vadd.f32 %v669_v47, %v578_v49 }
  0xc7   : > { %v444_v28 = vpop.f32.mrf.mxu0  ;;  %v566_v48 = vpop.f32.mrf.mxu2 }
  0xc8   : > { %v494_v50 = vadd.f32 %v493_v45, %v444_v28  ;;  %v496_v53 = vpop.f32.mrf.mxu1  ;;  %v695_v57 = vadd.f32 %v993_v18, %v683_v51 }
  0xca   : > { %v579_v52 = vadd.f32 %v566_v48, %v494_v50 }
  0xcd   : > { %v671_v54 = vpop.f32.mrf.mxu3 }
  0xce   : > { %v684_v55 = vadd.f32 %v671_v54, %v579_v52 }
  0xcf   : > { %v447_v56 = vpop.f32.mrf.mxu0  ;;  %v569_v59 = vpop.f32.mrf.mxu2 }
  0xd0   : > { %v696_v58 = vadd.f32 %v993_v18, %v684_v55  ;;  %v497_v61 = vadd.f32 %v496_v53, %v447_v56  ;;  %v498_v63 = vpop.f32.mrf.mxu1 }
  0xd2   : > { %v941_v60 = vpack.c.bf16 %v696_v58, %v695_v57  ;;  %v580_v1 = vadd.f32 %v569_v59, %v497_v61 }
  0xd4   : > { %949 = vst [vmem:[%s1180_s20 + $0x10] sm:$0xff] %v941_v60  }
  0xd5   : > { %v674_v62 = vpop.f32.mrf.mxu3 }
  0xd6   : > { %v685_v5 = vadd.f32 %v674_v62, %v580_v1 }
  0xd7   : > { %v449_v0 = vpop.f32.mrf.mxu0  ;;  %v571_v3 = vpop.f32.mrf.mxu2 }
  0xd8   : > { %v499_v2 = vadd.f32 %v498_v63, %v449_v0  ;;  %v697_v8 = vadd.f32 %v993_v18, %v685_v5 }
  0xda   : > { %v581_v6 = vadd.f32 %v571_v3, %v499_v2 }
  0xdd   : > { %v676_v4 = vpop.f32.mrf.mxu3 }
  0xde   : > { %v686_v7 = vadd.f32 %v676_v4, %v581_v6 }
  0xe0   : > { %v698_v9 = vadd.f32 %v993_v18, %v686_v7 }
  0xe2   : > { %v946_v10 = vpack.c.bf16 %v698_v9, %v697_v8 }
  0xe4   : > { %950 = vst [vmem:[%s1180_s20 + $0x18] sm:$0xff] %v946_v10  }
  0xe5 PF: > { %s13_s16 = sadd.s32 1, %s1032_s16   ;;  %s1205_s12 = smov %s1024_s14 }
  0xe6   : > { %p10_p7 = scmp.ge.s32.totalorder %s13_s16, 6   ;;  %s1206_s13 = smov %s1028_s15 }
  0xe7   : > { %s1207_s14 = smov %s1210_s17  ;;  %s1208_s15 = smov %s1214_s18 }
  0xe8   :  { %12 = sbr.rel (!%p10_p7) target bundleno = 3 (0x3), region = 76 }

</bundles_post_ra>
